<compile_context>
chip_gen: v5e
topology: v5e:2x2
jax: 0.10.0
libtpu: 0.0.40
codegen_flags: <defaults>
</compile_context>

<pallas_src>
import functools

import jax
import jax.numpy as jnp
from jax.experimental import pallas as pl
from jax.experimental.pallas import tpu as pltpu


def _round_up(x, m):
    return ((x + m - 1) // m) * m


def _conv_out_dim(d, k, s, p):
    return (d + 2 * p - k) // s + 1


_SLOW_STRIDE = (1, 2, 2)
_FAST_STRIDE = (8, 2, 2)


# --------------------------------------------------------------------------
# Kernel 1: conv-as-matmul (+bias) with per-tile BatchNorm partial statistics.
# --------------------------------------------------------------------------

def _conv_stats_kernel(p_ref, w_ref, b_ref, y_ref, stats_ref, *, m_real, tm):
    i = pl.program_id(0)
    acc = jnp.dot(p_ref[...], w_ref[...], preferred_element_type=jnp.float32)
    acc = acc + b_ref[...]                              # (tm, Npad) pre-BN conv out
    y_ref[...] = acc
    # Partial BN statistics for this M-tile; mask rows that are only padding so
    # batch stats cover exactly M = B*Do*Ho*Wo (torch training-mode BN).
    rows = jax.lax.broadcasted_iota(jnp.int32, (tm, 1), 0) + i * tm
    masked = jnp.where(rows < m_real, acc, 0.0)
    s = jnp.sum(masked, axis=0, keepdims=True)          # (1, Npad)
    sq = jnp.sum(masked * masked, axis=0, keepdims=True)
    pad = jnp.zeros((6, s.shape[1]), jnp.float32)
    stats_ref[...] = jnp.concatenate([s, sq, pad], axis=0)   # (8, Npad)


def conv_matmul_stats(patches, w_mat, bias, m_real, tm):
    Mpad, Kp = patches.shape
    Npad = w_mat.shape[1]
    n_tiles = Mpad // tm
    kernel = functools.partial(_conv_stats_kernel, m_real=m_real, tm=tm)
    return pl.pallas_call(
        kernel,
        out_shape=(jax.ShapeDtypeStruct((Mpad, Npad), jnp.float32),
                   jax.ShapeDtypeStruct((n_tiles, 8, Npad), jnp.float32)),
        grid_spec=pltpu.PrefetchScalarGridSpec(
            num_scalar_prefetch=0,
            grid=(n_tiles,),
            in_specs=[
                pl.BlockSpec((tm, Kp), lambda i: (i, 0)),
                pl.BlockSpec((Kp, Npad), lambda i: (0, 0)),
                pl.BlockSpec((1, Npad), lambda i: (0, 0)),
            ],
            out_specs=(
                pl.BlockSpec((tm, Npad), lambda i: (i, 0)),
                pl.BlockSpec((None, 8, Npad), lambda i: (i, 0, 0)),
            ),
        ),
        compiler_params=pltpu.CompilerParams(
            dimension_semantics=("parallel",)),
    )(patches, w_mat, bias)


# --------------------------------------------------------------------------
# Kernel 2: folded BatchNorm (scale/shift) + ReLU, one FMA per element.
# --------------------------------------------------------------------------

def _bn_relu_kernel(y_ref, scale_ref, shift_ref, o_ref):
    o_ref[...] = jnp.maximum(y_ref[...] * scale_ref[...] + shift_ref[...],
                             0.0).astype(o_ref.dtype)


def bn_relu_apply(y, scale, shift, tm):
    Mpad, Npad = y.shape
    n_tiles = Mpad // tm
    return pl.pallas_call(
        _bn_relu_kernel,
        out_shape=jax.ShapeDtypeStruct((Mpad, Npad), jnp.bfloat16),
        grid_spec=pltpu.PrefetchScalarGridSpec(
            num_scalar_prefetch=0,
            grid=(n_tiles,),
            in_specs=[pl.BlockSpec((tm, Npad), lambda i: (i, 0)),
                      pl.BlockSpec((1, Npad), lambda i: (0, 0)),
                      pl.BlockSpec((1, Npad), lambda i: (0, 0))],
            out_specs=pl.BlockSpec((tm, Npad), lambda i: (i, 0)),
        ),
        compiler_params=pltpu.CompilerParams(
            dimension_semantics=("parallel",)),
    )(y, scale, shift)


# --------------------------------------------------------------------------
# Kernel 3: fused per-network fc Linear + softmax gate + expert mix + task heads.
#   grid = (network, K-tile); network 0 is the gate, networks 1..E the experts.
# --------------------------------------------------------------------------

def _fc_moe_kernel(flat_ref, w_ref, b_ref, tw_ref, tb_ref, o_ref,
                   acc_ref, gate_ref, final_ref):
    n = pl.program_id(0)
    k = pl.program_id(1)
    nk = pl.num_programs(1)
    n_nets = pl.num_programs(0)
    last_k = k == nk - 1

    @pl.when(k == 0)
    def _():
        acc_ref[...] = jnp.zeros_like(acc_ref)

    acc_ref[...] += jnp.dot(flat_ref[...], w_ref[...],
                            preferred_element_type=jnp.float32)

    @pl.when(jnp.logical_and(last_k, n == 0))
    def _():
        # Gate network: softmax over ALL 64 fc outputs (matches
        # torch f.softmax(gate(x), dim=1)); only columns 0..E-1 are later used
        # as mixture weights, exactly like the PyTorch module.
        y = acc_ref[...] + b_ref[...]                   # (Bp, 64)
        m = jnp.max(y, axis=1, keepdims=True)
        e = jnp.exp(y - m)
        gate_ref[...] = e / jnp.sum(e, axis=1, keepdims=True)
        final_ref[...] = jnp.zeros_like(final_ref)

    @pl.when(jnp.logical_and(last_k, n > 0))
    def _():
        # Expert (n-1): weight by gate softmax column (n-1).
        y = acc_ref[...] + b_ref[...]                   # (Bp, 64)
        lane = jax.lax.broadcasted_iota(jnp.int32, gate_ref.shape, 1)
        gw = jnp.sum(jnp.where(lane == n - 1, gate_ref[...], 0.0),
                     axis=1, keepdims=True)             # (Bp, 1)
        final_ref[...] += gw * y

    @pl.when(jnp.logical_and(last_k, n == n_nets - 1))
    def _():
        # Stacked task Linear(64, 1) heads -> lane-dense (Bp, Tpad) output.
        o_ref[...] = (jnp.dot(final_ref[...], tw_ref[...],
                              preferred_element_type=jnp.float32)
                      + tb_ref[...])


def fc_moe_fused(flat, fc_w, fc_b, task_w, task_b):
    nets, B, Kpad = flat.shape
    Tpad = task_w.shape[1]
    Bp = _round_up(B, 8)
    if Bp != B:
        flat = jnp.pad(flat, ((0, 0), (0, Bp - B), (0, 0)))
    tk = 512 if Kpad % 512 == 0 else (256 if Kpad % 256 == 0 else 128)
    nk = Kpad // tk
    out = pl.pallas_call(
        _fc_moe_kernel,
        out_shape=jax.ShapeDtypeStruct((Bp, Tpad), jnp.float32),
        grid_spec=pltpu.PrefetchScalarGridSpec(
            num_scalar_prefetch=0,
            grid=(nets, nk),
            in_specs=[
                pl.BlockSpec((None, Bp, tk), lambda n, k: (n, 0, k)),
                pl.BlockSpec((None, tk, 64), lambda n, k: (n, k, 0)),
                pl.BlockSpec((None, 1, 64), lambda n, k: (n, 0, 0)),
                pl.BlockSpec((64, Tpad), lambda n, k: (0, 0)),
                pl.BlockSpec((1, Tpad), lambda n, k: (0, 0)),
            ],
            out_specs=pl.BlockSpec((Bp, Tpad), lambda n, k: (0, 0)),
            scratch_shapes=[pltpu.VMEM((Bp, 64), jnp.float32),   # fc accumulator
                            pltpu.VMEM((Bp, 64), jnp.float32),   # gate softmax
                            pltpu.VMEM((Bp, 64), jnp.float32)],  # mixed experts
        ),
        compiler_params=pltpu.CompilerParams(
            dimension_semantics=("arbitrary", "arbitrary")),
    )(flat, fc_w, fc_b, task_w, task_b)
    return out[:B]


# ------------------------------- JAX glue -----------------------------------

def im2col_3d(x, ksize, stride, padding):
    # x: (B, C, D, H, W) -> patches (B*Do*Ho*Wo, C*kD*kH*kW) in bf16,
    # feature order (C, kD, kH, kW) == PyTorch Conv3d weight layout.
    B, C, D, H, W = x.shape
    kd, kh, kw = ksize
    sd, sh, sw = stride
    pd, ph, pw = padding
    xp = jnp.pad(x.astype(jnp.bfloat16),
                 ((0, 0), (0, 0), (pd, pd), (ph, ph), (pw, pw)))
    Do = _conv_out_dim(D, kd, sd, pd)
    Ho = _conv_out_dim(H, kh, sh, ph)
    Wo = _conv_out_dim(W, kw, sw, pw)
    pieces = []
    for dz in range(kd):
        for dy in range(kh):
            for dx in range(kw):
                pieces.append(xp[:, :, dz:dz + sd * Do:sd,
                                 dy:dy + sh * Ho:sh,
                                 dx:dx + sw * Wo:sw])      # (B, C, Do, Ho, Wo)
    p = jnp.stack(pieces, axis=2)                          # (B, C, 27, Do, Ho, Wo)
    p = p.transpose(0, 3, 4, 5, 1, 2)                      # (B, Do, Ho, Wo, C, 27)
    return p.reshape(B * Do * Ho * Wo, C * kd * kh * kw), (Do, Ho, Wo)


def maxpool3d_2(y):
    # y: (B, D, H, W, C); MaxPool3d(kernel=2, stride=2), floor mode.
    B, D, H, W, C = y.shape
    D2, H2, W2 = (D // 2) * 2, (H // 2) * 2, (W // 2) * 2
    y = y[:, :D2, :H2, :W2]
    y = y.reshape(B, D2 // 2, 2, H2 // 2, 2, W2 // 2, 2, C)
    return y.max(axis=(2, 4, 6))


def slowfast_moe_forward(x, params):
    B = x.shape[0]
    nets = params["num_networks"]
    feats = []
    for branch, stride, step in (("slow", _SLOW_STRIDE, 16),
                                 ("fast", _FAST_STRIDE, 2)):
        pr = params["conv"][branch]
        xb = x[:, :, ::step, :, :]
        patches, (Do, Ho, Wo) = im2col_3d(xb, (3, 3, 3), stride, (1, 1, 1))
        M, K = patches.shape
        Kp, Npad = pr["w_mat"].shape
        tm = 1024 if M >= 1024 else _round_up(M, 8)
        Mpad = _round_up(M, tm)
        patches = jnp.pad(patches, ((0, Mpad - M), (0, Kp - K)))

        # Fused conv (+bias) for gate + all experts, with BN partial stats.
        y, stats = conv_matmul_stats(patches, pr["w_mat"], pr["bias"], M, tm)

        # Finalize training-mode BatchNorm3d batch statistics over the full M
        # and fold gamma*rsqrt(var+eps) into one scale/shift pair per channel.
        # TODO(synk): E[x^2]-E[x]^2 can lose precision for huge activations;
        # switch to a mean-subtracted second pass if that ever matters.
        s = jnp.sum(stats[:, 0, :], axis=0)
        sq = jnp.sum(stats[:, 1, :], axis=0)
        mean = s / M
        var = jnp.maximum(sq / M - mean * mean, 0.0)       # biased var, as torch BN
        inv_std = jax.lax.rsqrt(var + 1e-5)
        scale = (pr["gamma"] * inv_std)[None, :]
        shift = (pr["beta"] - mean * pr["gamma"] * inv_std)[None, :]

        act = bn_relu_apply(y, scale, shift, tm)           # (Mpad, Npad) bf16
        act = act[:M].reshape(B, Do, Ho, Wo, Npad)         # channel-last
        pooled = maxpool3d_2(act)                          # (B, Dp, Hp, Wp, Npad)
        Dp, Hp, Wp = pooled.shape[1:4]
        spatial = Dp * Hp * Wp
        pooled = pooled[..., :32 * nets].reshape(B, spatial, nets, 32)
        pooled = pooled.transpose(2, 0, 1, 3).reshape(nets, B, spatial * 32)
        feats.append(pooled)

    flat = jnp.concatenate(feats, axis=2)                  # (nets, B, fc_in) bf16
    Kpad = params["fc_w"].shape[1]
    flat = jnp.pad(flat, ((0, 0), (0, 0), (0, Kpad - flat.shape[2])))

    out = fc_moe_fused(flat, params["fc_w"], params["fc_b"],
                       params["task_w"], params["task_b"])  # (B, Tpad)
    return out[:, :params["num_tasks"]]


# --------------------------- parameter construction -------------------------

def _branch_flat_features(d_in, h, w, stride):
    Do = _conv_out_dim(d_in, 3, stride[0], 1)
    Ho = _conv_out_dim(h, 3, stride[1], 1)
    Wo = _conv_out_dim(w, 3, stride[2], 1)
    return 32 * (Do // 2) * (Ho // 2) * (Wo // 2)


def init_moe_params(key, in_channels, num_experts, depth, height, width, num_tasks):
    nets = num_experts + 1            # network 0 = gate, 1..E = experts
    K = in_channels * 27
    Kp = _round_up(K, 128)
    Npad = _round_up(32 * nets, 128)

    d_slow = -(-depth // 16)          # len of x[:, :, ::16, :, :] along D
    d_fast = -(-depth // 2)           # len of x[:, :, ::2,  :, :] along D
    fc_in = (_branch_flat_features(d_slow, height, width, _SLOW_STRIDE)
             + _branch_flat_features(d_fast, height, width, _FAST_STRIDE))
    Kpad_fc = _round_up(fc_in, 128)
    Tpad = _round_up(num_tasks, 128)

    keys = iter(jax.random.split(key, 6 * nets + 2))

    def conv_branch():
        w_cols, b_cols = [], []
        for _ in range(nets):
            w = jax.random.normal(next(keys), (32, in_channels, 3, 3, 3),
                                  jnp.float32) * 0.1
            b = jax.random.normal(next(keys), (32,), jnp.float32) * 0.1
            w_cols.append(w.reshape(32, -1).T)          # (K, 32), PyTorch row order
            b_cols.append(b)
        w_mat = jnp.concatenate(w_cols, axis=1)         # (K, 32*nets)
        w_mat = jnp.pad(w_mat, ((0, Kp - K), (0, Npad - 32 * nets)))
        bias = jnp.pad(jnp.concatenate(b_cols), (0, Npad - 32 * nets))
        gamma = jnp.pad(jnp.ones((32 * nets,), jnp.float32), (0, Npad - 32 * nets))
        beta = jnp.zeros((Npad,), jnp.float32)          # BatchNorm3d default affine
        return {"w_mat": w_mat.astype(jnp.bfloat16),
                "bias": bias.reshape(1, Npad),
                "gamma": gamma,
                "beta": beta}

    conv = {"slow": conv_branch(), "fast": conv_branch()}

    fc_w, fc_b = [], []
    for _ in range(nets):
        w = jax.random.normal(next(keys), (fc_in, 64), jnp.float32) * 0.05
        b = jax.random.normal(next(keys), (1, 64), jnp.float32) * 0.05
        fc_w.append(jnp.pad(w, ((0, Kpad_fc - fc_in), (0, 0))))
        fc_b.append(b)

    task_w = jax.random.normal(next(keys), (64, num_tasks), jnp.float32) * 0.1
    task_b = jax.random.normal(next(keys), (1, num_tasks), jnp.float32) * 0.1

    return {
        "num_networks": nets,
        "num_tasks": num_tasks,
        "conv": conv,
        # fc weight rows are in channel-last (D,H,W,C) feature order, slow
        # branch first then fast (one-time row permute when porting torch weights).
        "fc_w": jnp.stack(fc_w).astype(jnp.bfloat16),    # (nets, Kpad_fc, 64)
        "fc_b": jnp.stack(fc_b),                         # (nets, 1, 64) f32
        "task_w": jnp.pad(task_w, ((0, 0), (0, Tpad - num_tasks))),
        "task_b": jnp.pad(task_b, ((0, 0), (0, Tpad - num_tasks))),
    }


# ----------------------------------- main ------------------------------------

if __name__ == "__main__":
    B, C, D, H, W = 2, 3, 32, 16, 16        # depth=32 so the slow path keeps 2 frames
    num_experts, num_tasks = 2, 3

    key = jax.random.PRNGKey(0)
    kp, kx = jax.random.split(key)
    params = init_moe_params(kp, C, num_experts, D, H, W, num_tasks)
    x = jax.random.normal(kx, (B, C, D, H, W), jnp.float32)

    out = jax.jit(lambda xx: slowfast_moe_forward(xx, params))(x)
    out = jax.block_until_ready(out)
    assert out.shape == (B, num_tasks), out.shape
    assert bool(jnp.all(jnp.isfinite(out)))
    print("KERNEL_OK")
</pallas_src>

<mosaic_0001>
module attributes {stable_mosaic.version = 11 : i64} {
  func.func @_conv_stats_kernel(%arg0: i32, %arg1: memref<256x128xbf16, #tpu.memory_space<vmem>>, %arg2: memref<128x128xbf16, #tpu.memory_space<vmem>>, %arg3: memref<1x128xf32, #tpu.memory_space<vmem>>, %arg4: memref<256x128xf32, #tpu.memory_space<vmem>>, %arg5: memref<1x8x128xf32, #tpu.memory_space<vmem>>) attributes {dimension_semantics = [#tpu.dimension_semantics<parallel>], iteration_bounds = array<i64: 1>, scalar_prefetch = 0 : i64, scratch_operands = 0 : i64, tpu.core_type = #tpu.core_type<tc>, window_params = [{transform_indices = @transform_0, window_bounds = array<i64: 256, 128>}, {pipeline_mode = #tpu.pipeline_mode<synchronous>, transform_indices = @transform_1, window_bounds = array<i64: 128, 128>}, {pipeline_mode = #tpu.pipeline_mode<synchronous>, transform_indices = @transform_2, window_bounds = array<i64: 1, 128>}, {transform_indices = @transform_3, window_bounds = array<i64: 256, 128>}, {transform_indices = @transform_4, window_bounds = array<i64: 1, 8, 128>}]} {
    %c0 = arith.constant 0 : index
    %c0_0 = arith.constant 0 : index
    %0 = vector.load %arg1[%c0, %c0_0] : memref<256x128xbf16, #tpu.memory_space<vmem>>, vector<256x128xbf16>
    %c0_1 = arith.constant 0 : index
    %c0_2 = arith.constant 0 : index
    %1 = vector.load %arg2[%c0_1, %c0_2] : memref<128x128xbf16, #tpu.memory_space<vmem>>, vector<128x128xbf16>
    %cst = arith.constant dense<0.000000e+00> : vector<256x128xf32>
    %2 = tpu.matmul %0, %1, %cst {dimension_numbers = #tpu.dot_dimension_numbers<[1], [0], [0], [1], [0, 0, 1, 1], [], []>} : vector<256x128xbf16>, vector<128x128xbf16>, vector<256x128xf32> -> vector<256x128xf32>
    %c0_3 = arith.constant 0 : index
    %c0_4 = arith.constant 0 : index
    %3 = vector.load %arg3[%c0_3, %c0_4] : memref<1x128xf32, #tpu.memory_space<vmem>>, vector<1x128xf32>
    %4 = vector.broadcast %3 : vector<1x128xf32> to vector<256x128xf32>
    %5 = arith.addf %2, %4 : vector<256x128xf32>
    %c0_5 = arith.constant 0 : index
    %c0_6 = arith.constant 0 : index
    %6 = vector.load %arg4[%c0_5, %c0_6] : memref<256x128xf32, #tpu.memory_space<vmem>>, vector<256x128xf32>
    tpu.vector_store %arg4[%c0_5, %c0_6], %5 {strides = array<i32>} : memref<256x128xf32, #tpu.memory_space<vmem>>, vector<256x128xf32>,
    %7 = tpu.iota {dimensions = array<i32: 0>} : vector<256x1xi32>
    %c256_i32 = arith.constant 256 : i32
    %8 = arith.muli %arg0, %c256_i32 : i32
    %9 = vector.broadcast %8 : i32 to vector<256x1xi32>
    %10 = arith.addi %7, %9 : vector<256x1xi32>
    %c256_i32_7 = arith.constant 256 : i32
    %11 = vector.broadcast %c256_i32_7 : i32 to vector<256x1xi32>
    %12 = arith.cmpi slt, %10, %11 : vector<256x1xi32>
    %cst_8 = arith.constant 0.000000e+00 : f32
    %13 = vector.shape_cast %12 : vector<256x1xi1> to vector<256x1xi1>
    %14 = vector.broadcast %13 : vector<256x1xi1> to vector<256x128xi1>
    %15 = vector.broadcast %cst_8 : f32 to vector<256x128xf32>
    %16 = arith.select %14, %5, %15 : vector<256x128xi1>, vector<256x128xf32>
    %cst_9 = arith.constant dense<0.000000e+00> : vector<128xf32>
    %17 = vector.multi_reduction <add>, %16, %cst_9 [0] : vector<256x128xf32> to vector<128xf32>
    %18 = vector.shape_cast %17 : vector<128xf32> to vector<1x128xf32>
    %19 = arith.mulf %16, %16 : vector<256x128xf32>
    %cst_10 = arith.constant dense<0.000000e+00> : vector<128xf32>
    %20 = vector.multi_reduction <add>, %19, %cst_10 [0] : vector<256x128xf32> to vector<128xf32>
    %21 = vector.shape_cast %20 : vector<128xf32> to vector<1x128xf32>
    %cst_11 = arith.constant 0.000000e+00 : f32
    %22 = vector.broadcast %cst_11 : f32 to vector<6x128xf32>
    %23 = tpu.concatenate %18, %21, %22 in 0 : vector<1x128xf32>, vector<1x128xf32>, vector<6x128xf32> -> vector<8x128xf32>
    %c0_12 = arith.constant 0 : index
    %c0_13 = arith.constant 0 : index
    %c0_14 = arith.constant 0 : index
    %24 = vector.load %arg5[%c0_12, %c0_13, %c0_14] : memref<1x8x128xf32, #tpu.memory_space<vmem>>, vector<1x8x128xf32>
    %25 = vector.shape_cast %24 : vector<1x8x128xf32> to vector<8x128xf32>
    %26 = vector.shape_cast %23 : vector<8x128xf32> to vector<1x8x128xf32>
    tpu.vector_store %arg5[%c0_12, %c0_13, %c0_14], %26 {strides = array<i32>} : memref<1x8x128xf32, #tpu.memory_space<vmem>>, vector<1x8x128xf32>,
    return
  }
  func.func @transform_0(%arg0: i32) -> (i32, i32) {
    %c0_i32 = arith.constant 0 : i32
    %c0_i32_0 = arith.constant 0 : i32
    return %arg0, %c0_i32 : i32, i32
  }
  func.func @transform_1(%arg0: i32) -> (i32, i32) {
    %c0_i32 = arith.constant 0 : i32
    %c0_i32_0 = arith.constant 0 : i32
    %c0_i32_1 = arith.constant 0 : i32
    return %c0_i32, %c0_i32_0 : i32, i32
  }
  func.func @transform_2(%arg0: i32) -> (i32, i32) {
    %c0_i32 = arith.constant 0 : i32
    %c0_i32_0 = arith.constant 0 : i32
    %c0_i32_1 = arith.constant 0 : i32
    return %c0_i32, %c0_i32_0 : i32, i32
  }
  func.func @transform_3(%arg0: i32) -> (i32, i32) {
    %c0_i32 = arith.constant 0 : i32
    %c0_i32_0 = arith.constant 0 : i32
    return %arg0, %c0_i32 : i32, i32
  }
  func.func @transform_4(%arg0: i32) -> (i32, i32, i32) {
    %c0_i32 = arith.constant 0 : i32
    %c0_i32_0 = arith.constant 0 : i32
    %c0_i32_1 = arith.constant 0 : i32
    return %arg0, %c0_i32, %c0_i32_0 : i32, i32, i32
  }
}

module attributes {stable_mosaic.version = 11 : i64} {
  func.func @_bn_relu_kernel(%arg0: i32, %arg1: memref<256x128xf32, #tpu.memory_space<vmem>>, %arg2: memref<1x128xf32, #tpu.memory_space<vmem>>, %arg3: memref<1x128xf32, #tpu.memory_space<vmem>>, %arg4: memref<256x128xbf16, #tpu.memory_space<vmem>>) attributes {dimension_semantics = [#tpu.dimension_semantics<parallel>], iteration_bounds = array<i64: 1>, scalar_prefetch = 0 : i64, scratch_operands = 0 : i64, tpu.core_type = #tpu.core_type<tc>, window_params = [{transform_indices = @transform_0, window_bounds = array<i64: 256, 128>}, {pipeline_mode = #tpu.pipeline_mode<synchronous>, transform_indices = @transform_1, window_bounds = array<i64: 1, 128>}, {pipeline_mode = #tpu.pipeline_mode<synchronous>, transform_indices = @transform_2, window_bounds = array<i64: 1, 128>}, {transform_indices = @transform_3, window_bounds = array<i64: 256, 128>}]} {
    %c0 = arith.constant 0 : index
    %c0_0 = arith.constant 0 : index
    %0 = vector.load %arg1[%c0, %c0_0] : memref<256x128xf32, #tpu.memory_space<vmem>>, vector<256x128xf32>
    %c0_1 = arith.constant 0 : index
    %c0_2 = arith.constant 0 : index
    %1 = vector.load %arg2[%c0_1, %c0_2] : memref<1x128xf32, #tpu.memory_space<vmem>>, vector<1x128xf32>
    %2 = vector.broadcast %1 : vector<1x128xf32> to vector<256x128xf32>
    %3 = arith.mulf %0, %2 : vector<256x128xf32>
    %c0_3 = arith.constant 0 : index
    %c0_4 = arith.constant 0 : index
    %4 = vector.load %arg3[%c0_3, %c0_4] : memref<1x128xf32, #tpu.memory_space<vmem>>, vector<1x128xf32>
    %5 = vector.broadcast %4 : vector<1x128xf32> to vector<256x128xf32>
    %6 = arith.addf %3, %5 : vector<256x128xf32>
    %cst = arith.constant 0.000000e+00 : f32
    %7 = vector.broadcast %cst : f32 to vector<256x128xf32>
    %8 = arith.maximumf %6, %7 : vector<256x128xf32>
    %9 = arith.truncf %8 : vector<256x128xf32> to vector<256x128xbf16>
    %c0_5 = arith.constant 0 : index
    %c0_6 = arith.constant 0 : index
    %10 = vector.load %arg4[%c0_5, %c0_6] : memref<256x128xbf16, #tpu.memory_space<vmem>>, vector<256x128xbf16>
    tpu.vector_store %arg4[%c0_5, %c0_6], %9 {strides = array<i32>} : memref<256x128xbf16, #tpu.memory_space<vmem>>, vector<256x128xbf16>,
    return
  }
  func.func @transform_0(%arg0: i32) -> (i32, i32) {
    %c0_i32 = arith.constant 0 : i32
    %c0_i32_0 = arith.constant 0 : i32
    return %arg0, %c0_i32 : i32, i32
  }
  func.func @transform_1(%arg0: i32) -> (i32, i32) {
    %c0_i32 = arith.constant 0 : i32
    %c0_i32_0 = arith.constant 0 : i32
    %c0_i32_1 = arith.constant 0 : i32
    return %c0_i32, %c0_i32_0 : i32, i32
  }
  func.func @transform_2(%arg0: i32) -> (i32, i32) {
    %c0_i32 = arith.constant 0 : i32
    %c0_i32_0 = arith.constant 0 : i32
    %c0_i32_1 = arith.constant 0 : i32
    return %c0_i32, %c0_i32_0 : i32, i32
  }
  func.func @transform_3(%arg0: i32) -> (i32, i32) {
    %c0_i32 = arith.constant 0 : i32
    %c0_i32_0 = arith.constant 0 : i32
    return %arg0, %c0_i32 : i32, i32
  }
}

module attributes {stable_mosaic.version = 11 : i64} {
  func.func @_fc_moe_kernel(%arg0: i32, %arg1: i32, %arg2: memref<1x8x512xbf16, #tpu.memory_space<vmem>>, %arg3: memref<1x512x64xbf16, #tpu.memory_space<vmem>>, %arg4: memref<1x1x64xf32, #tpu.memory_space<vmem>>, %arg5: memref<64x128xf32, #tpu.memory_space<vmem>>, %arg6: memref<1x128xf32, #tpu.memory_space<vmem>>, %arg7: memref<8x128xf32, #tpu.memory_space<vmem>>, %arg8: memref<8x64xf32, #tpu.memory_space<vmem>>, %arg9: memref<8x64xf32, #tpu.memory_space<vmem>>, %arg10: memref<8x64xf32, #tpu.memory_space<vmem>>) attributes {dimension_semantics = [#tpu.dimension_semantics<arbitrary>, #tpu.dimension_semantics<arbitrary>], iteration_bounds = array<i64: 3, 2>, scalar_prefetch = 0 : i64, scratch_operands = 3 : i64, tpu.core_type = #tpu.core_type<tc>, window_params = [{transform_indices = @transform_0, window_bounds = array<i64: 1, 8, 512>}, {transform_indices = @transform_1, window_bounds = array<i64: 1, 512, 64>}, {transform_indices = @transform_2, window_bounds = array<i64: 1, 1, 64>}, {pipeline_mode = #tpu.pipeline_mode<synchronous>, transform_indices = @transform_3, window_bounds = array<i64: 64, 128>}, {pipeline_mode = #tpu.pipeline_mode<synchronous>, transform_indices = @transform_4, window_bounds = array<i64: 1, 128>}, {pipeline_mode = #tpu.pipeline_mode<synchronous>, transform_indices = @transform_5, window_bounds = array<i64: 8, 128>}]} {
    %c1_i32 = arith.constant 1 : i32
    %0 = arith.cmpi eq, %arg1, %c1_i32 : i32
    %c0_i32 = arith.constant 0 : i32
    %1 = arith.cmpi eq, %arg1, %c0_i32 : i32
    %2 = arith.extui %1 : i1 to i32
    %c0_i32_0 = arith.constant 0 : i32
    %3 = arith.cmpi ne, %2, %c0_i32_0 : i32
    scf.if %3 {
      %cst_15 = arith.constant 0.000000e+00 : f32
      %24 = vector.broadcast %cst_15 : f32 to vector<8x64xf32>
      %c0_16 = arith.constant 0 : index
      %c0_17 = arith.constant 0 : index
      %25 = vector.load %arg8[%c0_16, %c0_17] : memref<8x64xf32, #tpu.memory_space<vmem>>, vector<8x64xf32>
      tpu.vector_store %arg8[%c0_16, %c0_17], %24 {strides = array<i32>} : memref<8x64xf32, #tpu.memory_space<vmem>>, vector<8x64xf32>,
    } else {
    }
    %c0 = arith.constant 0 : index
    %c0_1 = arith.constant 0 : index
    %4 = vector.load %arg8[%c0, %c0_1] : memref<8x64xf32, #tpu.memory_space<vmem>>, vector<8x64xf32>
    %c0_2 = arith.constant 0 : index
    %c0_3 = arith.constant 0 : index
    %c0_4 = arith.constant 0 : index
    %5 = vector.load %arg2[%c0_2, %c0_3, %c0_4] : memref<1x8x512xbf16, #tpu.memory_space<vmem>>, vector<1x8x512xbf16>
    %6 = vector.shape_cast %5 : vector<1x8x512xbf16> to vector<8x512xbf16>
    %c0_5 = arith.constant 0 : index
    %c0_6 = arith.constant 0 : index
    %c0_7 = arith.constant 0 : index
    %7 = vector.load %arg3[%c0_5, %c0_6, %c0_7] : memref<1x512x64xbf16, #tpu.memory_space<vmem>>, vector<1x512x64xbf16>
    %8 = vector.shape_cast %7 : vector<1x512x64xbf16> to vector<512x64xbf16>
    %cst = arith.constant dense<0.000000e+00> : vector<8x64xf32>
    %9 = tpu.matmul %6, %8, %cst {dimension_numbers = #tpu.dot_dimension_numbers<[1], [0], [0], [1], [0, 0, 1, 1], [], []>} : vector<8x512xbf16>, vector<512x64xbf16>, vector<8x64xf32> -> vector<8x64xf32>
    %10 = arith.addf %4, %9 : vector<8x64xf32>
    %c0_8 = arith.constant 0 : index
    %c0_9 = arith.constant 0 : index
    %11 = vector.load %arg8[%c0_8, %c0_9] : memref<8x64xf32, #tpu.memory_space<vmem>>, vector<8x64xf32>
    tpu.vector_store %arg8[%c0_8, %c0_9], %10 {strides = array<i32>} : memref<8x64xf32, #tpu.memory_space<vmem>>, vector<8x64xf32>,
    %c0_i32_10 = arith.constant 0 : i32
    %12 = arith.cmpi eq, %arg0, %c0_i32_10 : i32
    %13 = arith.andi %0, %12 : i1
    %14 = arith.extui %13 : i1 to i32
    %c0_i32_11 = arith.constant 0 : i32
    %15 = arith.cmpi ne, %14, %c0_i32_11 : i32
    scf.if %15 {
      %c0_15 = arith.constant 0 : index
      %c0_16 = arith.constant 0 : index
      %24 = vector.load %arg8[%c0_15, %c0_16] : memref<8x64xf32, #tpu.memory_space<vmem>>, vector<8x64xf32>
      %c0_17 = arith.constant 0 : index
      %c0_18 = arith.constant 0 : index
      %c0_19 = arith.constant 0 : index
      %25 = vector.load %arg4[%c0_17, %c0_18, %c0_19] : memref<1x1x64xf32, #tpu.memory_space<vmem>>, vector<1x1x64xf32>
      %26 = vector.shape_cast %25 : vector<1x1x64xf32> to vector<1x64xf32>
      %27 = vector.broadcast %26 : vector<1x64xf32> to vector<8x64xf32>
      %28 = arith.addf %24, %27 : vector<8x64xf32>
      %cst_20 = arith.constant dense<0xFF800000> : vector<8xf32>
      %29 = vector.multi_reduction <maximumf>, %28, %cst_20 [1] : vector<8x64xf32> to vector<8xf32>
      %30 = vector.shape_cast %29 : vector<8xf32> to vector<8x1xf32>
      %31 = vector.broadcast %30 : vector<8x1xf32> to vector<8x64xf32>
      %32 = arith.subf %28, %31 : vector<8x64xf32>
      %33 = math.exp %32 : vector<8x64xf32>
      %cst_21 = arith.constant dense<0.000000e+00> : vector<8xf32>
      %34 = vector.multi_reduction <add>, %33, %cst_21 [1] : vector<8x64xf32> to vector<8xf32>
      %35 = vector.shape_cast %34 : vector<8xf32> to vector<8x1xf32>
      %36 = vector.broadcast %35 : vector<8x1xf32> to vector<8x64xf32>
      %37 = arith.divf %33, %36 : vector<8x64xf32>
      %c0_22 = arith.constant 0 : index
      %c0_23 = arith.constant 0 : index
      %38 = vector.load %arg9[%c0_22, %c0_23] : memref<8x64xf32, #tpu.memory_space<vmem>>, vector<8x64xf32>
      tpu.vector_store %arg9[%c0_22, %c0_23], %37 {strides = array<i32>} : memref<8x64xf32, #tpu.memory_space<vmem>>, vector<8x64xf32>,
      %cst_24 = arith.constant 0.000000e+00 : f32
      %39 = vector.broadcast %cst_24 : f32 to vector<8x64xf32>
      %c0_25 = arith.constant 0 : index
      %c0_26 = arith.constant 0 : index
      %40 = vector.load %arg10[%c0_25, %c0_26] : memref<8x64xf32, #tpu.memory_space<vmem>>, vector<8x64xf32>
      tpu.vector_store %arg10[%c0_25, %c0_26], %39 {strides = array<i32>} : memref<8x64xf32, #tpu.memory_space<vmem>>, vector<8x64xf32>,
    } else {
    }
    %c0_i32_12 = arith.constant 0 : i32
    %16 = arith.cmpi sgt, %arg0, %c0_i32_12 : i32
    %17 = arith.andi %0, %16 : i1
    %18 = arith.extui %17 : i1 to i32
    %c0_i32_13 = arith.constant 0 : i32
    %19 = arith.cmpi ne, %18, %c0_i32_13 : i32
    scf.if %19 {
      %c0_15 = arith.constant 0 : index
      %c0_16 = arith.constant 0 : index
      %24 = vector.load %arg8[%c0_15, %c0_16] : memref<8x64xf32, #tpu.memory_space<vmem>>, vector<8x64xf32>
      %c0_17 = arith.constant 0 : index
      %c0_18 = arith.constant 0 : index
      %c0_19 = arith.constant 0 : index
      %25 = vector.load %arg4[%c0_17, %c0_18, %c0_19] : memref<1x1x64xf32, #tpu.memory_space<vmem>>, vector<1x1x64xf32>
      %26 = vector.shape_cast %25 : vector<1x1x64xf32> to vector<1x64xf32>
      %27 = vector.broadcast %26 : vector<1x64xf32> to vector<8x64xf32>
      %28 = arith.addf %24, %27 : vector<8x64xf32>
      %29 = tpu.iota {dimensions = array<i32: 1>} : vector<8x64xi32>
      %c1_i32_20 = arith.constant 1 : i32
      %30 = arith.subi %arg0, %c1_i32_20 : i32
      %31 = vector.broadcast %30 : i32 to vector<8x64xi32>
      %32 = arith.cmpi eq, %29, %31 : vector<8x64xi32>
      %c0_21 = arith.constant 0 : index
      %c0_22 = arith.constant 0 : index
      %33 = vector.load %arg9[%c0_21, %c0_22] : memref<8x64xf32, #tpu.memory_space<vmem>>, vector<8x64xf32>
      %cst_23 = arith.constant 0.000000e+00 : f32
      %34 = vector.broadcast %cst_23 : f32 to vector<8x64xf32>
      %35 = arith.select %32, %33, %34 : vector<8x64xi1>, vector<8x64xf32>
      %cst_24 = arith.constant dense<0.000000e+00> : vector<8xf32>
      %36 = vector.multi_reduction <add>, %35, %cst_24 [1] : vector<8x64xf32> to vector<8xf32>
      %37 = vector.shape_cast %36 : vector<8xf32> to vector<8x1xf32>
      %c0_25 = arith.constant 0 : index
      %c0_26 = arith.constant 0 : index
      %38 = vector.load %arg10[%c0_25, %c0_26] : memref<8x64xf32, #tpu.memory_space<vmem>>, vector<8x64xf32>
      %39 = vector.broadcast %37 : vector<8x1xf32> to vector<8x64xf32>
      %40 = arith.mulf %39, %28 : vector<8x64xf32>
      %41 = arith.addf %38, %40 : vector<8x64xf32>
      %c0_27 = arith.constant 0 : index
      %c0_28 = arith.constant 0 : index
      %42 = vector.load %arg10[%c0_27, %c0_28] : memref<8x64xf32, #tpu.memory_space<vmem>>, vector<8x64xf32>
      tpu.vector_store %arg10[%c0_27, %c0_28], %41 {strides = array<i32>} : memref<8x64xf32, #tpu.memory_space<vmem>>, vector<8x64xf32>,
    } else {
    }
    %c2_i32 = arith.constant 2 : i32
    %20 = arith.cmpi eq, %arg0, %c2_i32 : i32
    %21 = arith.andi %0, %20 : i1
    %22 = arith.extui %21 : i1 to i32
    %c0_i32_14 = arith.constant 0 : i32
    %23 = arith.cmpi ne, %22, %c0_i32_14 : i32
    scf.if %23 {
      %c0_15 = arith.constant 0 : index
      %c0_16 = arith.constant 0 : index
      %24 = vector.load %arg10[%c0_15, %c0_16] : memref<8x64xf32, #tpu.memory_space<vmem>>, vector<8x64xf32>
      %c0_17 = arith.constant 0 : index
      %c0_18 = arith.constant 0 : index
      %25 = vector.load %arg5[%c0_17, %c0_18] : memref<64x128xf32, #tpu.memory_space<vmem>>, vector<64x128xf32>
      %cst_19 = arith.constant dense<0.000000e+00> : vector<8x128xf32>
      %26 = tpu.matmul %24, %25, %cst_19 {dimension_numbers = #tpu.dot_dimension_numbers<[1], [0], [0], [1], [0, 0, 1, 1], [], []>} : vector<8x64xf32>, vector<64x128xf32>, vector<8x128xf32> -> vector<8x128xf32>
      %c0_20 = arith.constant 0 : index
      %c0_21 = arith.constant 0 : index
      %27 = vector.load %arg6[%c0_20, %c0_21] : memref<1x128xf32, #tpu.memory_space<vmem>>, vector<1x128xf32>
      %28 = vector.broadcast %27 : vector<1x128xf32> to vector<8x128xf32>
      %29 = arith.addf %26, %28 : vector<8x128xf32>
      %c0_22 = arith.constant 0 : index
      %c0_23 = arith.constant 0 : index
      %30 = vector.load %arg7[%c0_22, %c0_23] : memref<8x128xf32, #tpu.memory_space<vmem>>, vector<8x128xf32>
      tpu.vector_store %arg7[%c0_22, %c0_23], %29 {strides = array<i32>} : memref<8x128xf32, #tpu.memory_space<vmem>>, vector<8x128xf32>,
    } else {
    }
    return
  }
  func.func @transform_0(%arg0: i32, %arg1: i32) -> (i32, i32, i32) {
    %c0_i32 = arith.constant 0 : i32
    %c0_i32_0 = arith.constant 0 : i32
    return %arg0, %c0_i32, %arg1 : i32, i32, i32
  }
  func.func @transform_1(%arg0: i32, %arg1: i32) -> (i32, i32, i32) {
    %c0_i32 = arith.constant 0 : i32
    %c0_i32_0 = arith.constant 0 : i32
    return %arg0, %arg1, %c0_i32 : i32, i32, i32
  }
  func.func @transform_2(%arg0: i32, %arg1: i32) -> (i32, i32, i32) {
    %c0_i32 = arith.constant 0 : i32
    %c0_i32_0 = arith.constant 0 : i32
    %c0_i32_1 = arith.constant 0 : i32
    return %arg0, %c0_i32, %c0_i32_0 : i32, i32, i32
  }
  func.func @transform_3(%arg0: i32, %arg1: i32) -> (i32, i32) {
    %c0_i32 = arith.constant 0 : i32
    %c0_i32_0 = arith.constant 0 : i32
    %c0_i32_1 = arith.constant 0 : i32
    return %c0_i32, %c0_i32_0 : i32, i32
  }
  func.func @transform_4(%arg0: i32, %arg1: i32) -> (i32, i32) {
    %c0_i32 = arith.constant 0 : i32
    %c0_i32_0 = arith.constant 0 : i32
    %c0_i32_1 = arith.constant 0 : i32
    return %c0_i32, %c0_i32_0 : i32, i32
  }
  func.func @transform_5(%arg0: i32, %arg1: i32) -> (i32, i32) {
    %c0_i32 = arith.constant 0 : i32
    %c0_i32_0 = arith.constant 0 : i32
    %c0_i32_1 = arith.constant 0 : i32
    return %c0_i32, %c0_i32_0 : i32, i32
  }
}

</mosaic_0001>

<bundles_post_ra>
// kernel: _lambda_.5
= control target key start
LH: loop header
LB: loop body
LE: loop exit
PB: predicated region body
PF: predicated region fallthrough
CT: control target
= control target key end

     0   :  { %vm634_vm0 = vcmask 1040384   ;;  %vm636_vm1 = vcmask 1041408   ;;  %s1157_s1 = inlined_call_operand.vmem [shape: bf16[128,128], index: 1, kind: input, shape index: {}]   ;;  %s1158_s2 = inlined_call_operand.vmem [shape: f32[1,128], index: 2, kind: input, shape index: {}]   ;;  %s1159_s0 = inlined_call_operand.vmem [shape: bf16[256,128], index: 0, kind: input, shape index: {}]   ;;  %s1160_s3 = inlined_call_operand.vmem [shape: f32[256,128], index: 3, kind: output, shape index: {0}]   ;;  %s1161_s4 = inlined_call_operand.vmem [shape: f32[1,8,128], index: 4, kind: output, shape index: {1}]  }
   0x1   :  { %v766_v0 = vld [vmem:[%s1157_s1 + $0x38] sm:$0xff]  ;;  %v765_v1 = vld [vmem:[%s1157_s1 + $0x30] sm:$0xff]  ;;  %v764_v2 = vld [vmem:[%s1157_s1 + $0x28] sm:$0xff] }
   0x2   :  { %212 = vmatpush.bf16.msra.mxu0 %v766_v0  ;;  %767 = vmatpush.bf16.msra.mxu1 %v766_v0  ;;  %v763_v3 = vld [vmem:[%s1157_s1 + $0x20] sm:$0xff]  ;;  %v762_v4 = vld [vmem:[%s1157_s1 + $0x18] sm:$0xff]  ;;  %v761_v5 = vld [vmem:[%s1157_s1 + $0x10] sm:$0xff] }
   0x3   :  { %768 = vmatpush.bf16.msra.mxu2 %v766_v0  ;;  %769 = vmatpush.bf16.msra.mxu3 %v766_v0  ;;  %v760_v6 = vld [vmem:[%s1157_s1 + $0x8] sm:$0xff]  ;;  %v759_v7 = vld [vmem:[%s1157_s1] sm:$0xff]  ;;  %v745_v16 = vld [vmem:[%s1159_s0 + $0x10] sm:$0xff] }
   0x4   :  { %v743_v8 = vld [vmem:[%s1159_s0] sm:$0xff]  ;;  %v744_v12 = vld [vmem:[%s1159_s0 + $0x8] sm:$0xff]  ;;  %v749_v17 = vld [vmem:[%s1159_s0 + $0x30] sm:$0xff] }
   0x5   :  { %v747_v9 = vld [vmem:[%s1159_s0 + $0x20] sm:$0xff]  ;;  %v748_v13 = vld [vmem:[%s1159_s0 + $0x28] sm:$0xff]  ;;  %v753_v18 = vld [vmem:[%s1159_s0 + $0x50] sm:$0xff] }
   0x6   :  { %213 = vmatpush.bf16.msra.mxu0 %v765_v1  ;;  %770 = vmatpush.bf16.msra.mxu1 %v765_v1  ;;  %v751_v10 = vld [vmem:[%s1159_s0 + $0x40] sm:$0xff]  ;;  %v752_v14 = vld [vmem:[%s1159_s0 + $0x48] sm:$0xff]  ;;  %v757_v19 = vld [vmem:[%s1159_s0 + $0x70] sm:$0xff] }
   0x7   :  { %771 = vmatpush.bf16.msra.mxu2 %v765_v1  ;;  %772 = vmatpush.bf16.msra.mxu3 %v765_v1  ;;  %v755_v11 = vld [vmem:[%s1159_s0 + $0x60] sm:$0xff]  ;;  %v756_v15 = vld [vmem:[%s1159_s0 + $0x68] sm:$0xff]  ;;  %v746_v20 = vld [vmem:[%s1159_s0 + $0x18] sm:$0xff] }
   0x8   :  { %v750_v21 = vld [vmem:[%s1159_s0 + $0x38] sm:$0xff]  ;;  %v892_v24 = vld [vmem:[%s1158_s2] ss:$0 sm:$0xff] }
   0x9   :  { %v754_v22 = vld [vmem:[%s1159_s0 + $0x58] sm:$0xff] }
   0xa   :  { %214 = vmatpush.bf16.msra.mxu0 %v764_v2  ;;  %773 = vmatpush.bf16.msra.mxu1 %v764_v2  ;;  %v758_v23 = vld [vmem:[%s1159_s0 + $0x78] sm:$0xff] }
   0xb   :  { %774 = vmatpush.bf16.msra.mxu2 %v764_v2  ;;  %775 = vmatpush.bf16.msra.mxu3 %v764_v2 }
   0xe   :  { %215 = vmatpush.bf16.msra.mxu0 %v763_v3  ;;  %776 = vmatpush.bf16.msra.mxu1 %v763_v3 }
   0xf   :  { %777 = vmatpush.bf16.msra.mxu2 %v763_v3  ;;  %778 = vmatpush.bf16.msra.mxu3 %v763_v3 }
  0x12   :  { %216 = vmatpush.bf16.msra.mxu0 %v762_v4  ;;  %779 = vmatpush.bf16.msra.mxu1 %v762_v4 }
  0x13   :  { %780 = vmatpush.bf16.msra.mxu2 %v762_v4  ;;  %781 = vmatpush.bf16.msra.mxu3 %v762_v4 }
  0x16   :  { %217 = vmatpush.bf16.msra.mxu0 %v761_v5  ;;  %782 = vmatpush.bf16.msra.mxu1 %v761_v5 }
  0x17   :  { %783 = vmatpush.bf16.msra.mxu2 %v761_v5  ;;  %784 = vmatpush.bf16.msra.mxu3 %v761_v5 }
  0x1a   :  { %218 = vmatpush.bf16.msra.mxu0 %v760_v6  ;;  %785 = vmatpush.bf16.msra.mxu1 %v760_v6 }
  0x1b   :  { %786 = vmatpush.bf16.msra.mxu2 %v760_v6  ;;  %787 = vmatpush.bf16.msra.mxu3 %v760_v6 }
  0x1e   :  { %219 = vmatpush.bf16.msra.mxu0 %v759_v7  ;;  %788 = vmatpush.bf16.msra.mxu1 %v759_v7 }
  0x1f   :  { %789 = vmatpush.bf16.msra.mxu2 %v759_v7  ;;  %790 = vmatpush.bf16.msra.mxu3 %v759_v7 }
  0x21   :  { %220 = vmatmul.bf16.vlgmr.msra.gmra.mxu0 %v743_v8  ;;  %240 = vmatmul.bf16.vlgmr.msra.gmra.mxu1 %v747_v9 }
  0x22   :  { %260 = vmatmul.bf16.vlgmr.msra.gmra.mxu2 %v751_v10  ;;  %280 = vmatmul.bf16.vlgmr.msra.gmra.mxu3 %v755_v11 }
  0x31   :  { %225 = vmatmul.bf16.gmra.mxu0 %v744_v12  ;;  %245 = vmatmul.bf16.gmra.mxu1 %v748_v13 }
  0x32   :  { %265 = vmatmul.bf16.gmra.mxu2 %v752_v14  ;;  %285 = vmatmul.bf16.gmra.mxu3 %v756_v15 }
  0x41   :  { %230 = vmatmul.bf16.gmra.mxu0 %v745_v16  ;;  %250 = vmatmul.bf16.gmra.mxu1 %v749_v17 }
  0x42   :  { %270 = vmatmul.bf16.gmra.mxu2 %v753_v18  ;;  %290 = vmatmul.bf16.gmra.mxu3 %v757_v19 }
  0x51   :  { %235 = vmatmul.bf16.gmra.mxu0 %v746_v20  ;;  %255 = vmatmul.bf16.gmra.mxu1 %v750_v21 }
  0x52   :  { %275 = vmatmul.bf16.gmra.mxu2 %v754_v22  ;;  %295 = vmatmul.bf16.gmra.mxu3 %v758_v23 }
  0x9e   :  { %v221_v25 = vpop.f32.mrf.mxu0  ;;  %v241_v26 = vpop.f32.mrf.mxu1 }
  0x9f   :  { %v895_v27 = vadd.f32 %v892_v24, %v221_v25  ;;  %v898_v28 = vadd.f32 %v892_v24, %v241_v26 }
  0xa1   :  { %301 = vst [vmem:[%s1160_s3] sm:$0xff] %v895_v27  ;;  %v565_v5 = vmul.f32 %v895_v27, %v895_v27 }
  0xa2   :  { %309 = vst [vmem:[%s1160_s3 + $0x40] sm:$0xff] %v898_v28 }
  0xa5   :  { %v261_v29 = vpop.f32.mrf.mxu2  ;;  %v281_v35 = vpop.f32.mrf.mxu3 }
  0xa6   :  { %v223_v30 = vpop.f32.mrf.mxu0  ;;  %v243_v31 = vpop.f32.mrf.mxu1  ;;  %v909_v32 = vadd.f32 %v892_v24, %v261_v29  ;;  %v927_v36 = vadd.f32 %v892_v24, %v281_v35 }
  0xa7   :  { %v224_v33 = vadd.f32 %v892_v24, %v223_v30  ;;  %v913_v34 = vadd.f32 %v892_v24, %v243_v31 }
  0xa8   :  { %317 = vst [vmem:[%s1160_s3 + $0x80] sm:$0xff] %v909_v32 }
  0xa9   :  { %302 = vst [vmem:[%s1160_s3 + $0x8] sm:$0xff] %v224_v33  ;;  %v566_v4 = vmul.f32 %v224_v33, %v224_v33  ;;  %v528_v6 = vadd.f32 %v224_v33, %v895_v27 }
  0xaa   :  { %310 = vst [vmem:[%s1160_s3 + $0x48] sm:$0xff] %v913_v34 }
  0xab   :  { %325 = vst [vmem:[%s1160_s3 + $0xc0] sm:$0xff] %v927_v36  ;;  %v597_v9 = vadd.f32 %v566_v4, %v565_v5 }
  0xad   :  { %v263_v37 = vpop.f32.mrf.mxu2  ;;  %v283_v43 = vpop.f32.mrf.mxu3 }
  0xae   :  { %v226_v38 = vpop.f32.mrf.mxu0  ;;  %v246_v39 = vpop.f32.mrf.mxu1  ;;  %v934_v40 = vadd.f32 %v892_v24, %v263_v37  ;;  %v945_v44 = vadd.f32 %v892_v24, %v283_v43 }
  0xaf   :  { %v227_v41 = vadd.f32 %v892_v24, %v226_v38  ;;  %v938_v42 = vadd.f32 %v892_v24, %v246_v39 }
  0xb0   :  { %318 = vst [vmem:[%s1160_s3 + $0x88] sm:$0xff] %v934_v40 }
  0xb1   :  { %303 = vst [vmem:[%s1160_s3 + $0x10] sm:$0xff] %v227_v41  ;;  %v567_v7 = vmul.f32 %v227_v41, %v227_v41  ;;  %v529_v10 = vadd.f32 %v528_v6, %v227_v41 }
  0xb2   :  { %311 = vst [vmem:[%s1160_s3 + $0x50] sm:$0xff] %v938_v42 }
  0xb3   :  { %326 = vst [vmem:[%s1160_s3 + $0xc8] sm:$0xff] %v945_v44  ;;  %v598_v20 = vadd.f32 %v597_v9, %v567_v7 }
  0xb5   :  { %v266_v45 = vpop.f32.mrf.mxu2  ;;  %v286_v51 = vpop.f32.mrf.mxu3 }
  0xb6   :  { %v228_v46 = vpop.f32.mrf.mxu0  ;;  %v248_v47 = vpop.f32.mrf.mxu1  ;;  %v959_v48 = vadd.f32 %v892_v24, %v266_v45  ;;  %v984_v58 = vadd.f32 %v892_v24, %v286_v51  ;;  %v573_v51 = vmul.f32 %v898_v28, %v898_v28 }
  0xb7   :  { %v229_v49 = vadd.f32 %v892_v24, %v228_v46  ;;  %v963_v50 = vadd.f32 %v892_v24, %v248_v47 }
  0xb8   :  { %319 = vst [vmem:[%s1160_s3 + $0x90] sm:$0xff] %v959_v48 }
  0xb9   :  { %304 = vst [vmem:[%s1160_s3 + $0x18] sm:$0xff] %v229_v49  ;;  %v568_v14 = vmul.f32 %v229_v49, %v229_v49  ;;  %v530_v21 = vadd.f32 %v529_v10, %v229_v49  ;;  %v576_v5 = vmul.f32 %v963_v50, %v963_v50 }
  0xba   :  { %312 = vst [vmem:[%s1160_s3 + $0x58] sm:$0xff] %v963_v50 }
  0xbb   :  { %327 = vst [vmem:[%s1160_s3 + $0xd0] sm:$0xff] %v984_v58  ;;  %v599_v23 = vadd.f32 %v598_v20, %v568_v14 }
  0xbd   :  { %v268_v52 = vpop.f32.mrf.mxu2  ;;  %v288_v59 = vpop.f32.mrf.mxu3 }
  0xbe   :  { %v231_v53 = vpop.f32.mrf.mxu0  ;;  %v251_v54 = vpop.f32.mrf.mxu1  ;;  %v977_v55 = vadd.f32 %v892_v24, %v268_v52  ;;  %v991_v60 = vadd.f32 %v892_v24, %v288_v59 }
  0xbf   :  { %v232_v56 = vadd.f32 %v892_v24, %v231_v53  ;;  %v981_v57 = vadd.f32 %v892_v24, %v251_v54  ;;  %v574_v54 = vmul.f32 %v913_v34, %v913_v34 }
  0xc0   :  { %320 = vst [vmem:[%s1160_s3 + $0x98] sm:$0xff] %v977_v55 }
  0xc1   :  { %305 = vst [vmem:[%s1160_s3 + $0x20] sm:$0xff] %v232_v56  ;;  %v569_v22 = vmul.f32 %v232_v56, %v232_v56  ;;  %v531_v25 = vadd.f32 %v530_v21, %v232_v56  ;;  %v581_v21 = vmul.f32 %v909_v32, %v909_v32 }
  0xc2   :  { %313 = vst [vmem:[%s1160_s3 + $0x60] sm:$0xff] %v981_v57 }
  0xc3   :  { %328 = vst [vmem:[%s1160_s3 + $0xd8] sm:$0xff] %v991_v60  ;;  %v600_v27 = vadd.f32 %v599_v23, %v569_v22 }
  0xc5   :  { %v271_v61 = vpop.f32.mrf.mxu2  ;;  %v291_v3 = vpop.f32.mrf.mxu3 }
  0xc6   :  { %v233_v62 = vpop.f32.mrf.mxu0  ;;  %v253_v63 = vpop.f32.mrf.mxu1  ;;  %v1009_v0 = vadd.f32 %v892_v24, %v271_v61  ;;  %v1035_v17 = vadd.f32 %v892_v24, %v291_v3 }
  0xc7   :  { %v234_v1 = vadd.f32 %v892_v24, %v233_v62  ;;  %v1013_v2 = vadd.f32 %v892_v24, %v253_v63  ;;  %v575_v63 = vmul.f32 %v938_v42, %v938_v42 }
  0xc8   :  { %321 = vst [vmem:[%s1160_s3 + $0xa0] sm:$0xff] %v1009_v0 }
  0xc9   :  { %306 = vst [vmem:[%s1160_s3 + $0x28] sm:$0xff] %v234_v1  ;;  %v570_v26 = vmul.f32 %v234_v1, %v234_v1  ;;  %v532_v29 = vadd.f32 %v531_v25, %v234_v1  ;;  %v578_v9 = vmul.f32 %v1013_v2, %v1013_v2 }
  0xca   :  { %314 = vst [vmem:[%s1160_s3 + $0x68] sm:$0xff] %v1013_v2 }
  0xcb   :  { %329 = vst [vmem:[%s1160_s3 + $0xe0] sm:$0xff] %v1035_v17  ;;  %v601_v38 = vadd.f32 %v600_v27, %v570_v26 }
  0xcd   :  { %v273_v8 = vpop.f32.mrf.mxu2  ;;  %v293_v18 = vpop.f32.mrf.mxu3 }
  0xce   :  { %v236_v11 = vpop.f32.mrf.mxu0  ;;  %v256_v12 = vpop.f32.mrf.mxu1  ;;  %v1030_v13 = vadd.f32 %v892_v24, %v273_v8  ;;  %v1042_v19 = vadd.f32 %v892_v24, %v293_v18 }
  0xcf   :  { %v237_v15 = vadd.f32 %v892_v24, %v236_v11  ;;  %v257_v16 = vadd.f32 %v892_v24, %v256_v12 }
  0xd0   :  { %322 = vst [vmem:[%s1160_s3 + $0xa8] sm:$0xff] %v1030_v13 }
  0xd1   :  { %307 = vst [vmem:[%s1160_s3 + $0x30] sm:$0xff] %v237_v15  ;;  %v571_v30 = vmul.f32 %v237_v15, %v237_v15  ;;  %v533_v39 = vadd.f32 %v532_v29, %v237_v15  ;;  %v579_v12 = vmul.f32 %v257_v16, %v257_v16  ;;  %v584_v29 = vmul.f32 %v977_v55, %v977_v55 }
  0xd2   :  { %315 = vst [vmem:[%s1160_s3 + $0x70] sm:$0xff] %v257_v16 }
  0xd3   :  { %330 = vst [vmem:[%s1160_s3 + $0xe8] sm:$0xff] %v1042_v19  ;;  %v602_v46 = vadd.f32 %v601_v38, %v571_v30  ;;  %v586_v38 = vmul.f32 %v1030_v13, %v1030_v13 }
  0xd5   :  { %v276_v31 = vpop.f32.mrf.mxu2  ;;  %v296_v45 = vpop.f32.mrf.mxu3 }
  0xd6   :  { %v238_v33 = vpop.f32.mrf.mxu0  ;;  %v258_v35 = vpop.f32.mrf.mxu1  ;;  %v1059_v37 = vadd.f32 %v892_v24, %v276_v31  ;;  %v1084_v4 = vadd.f32 %v892_v24, %v296_v45 }
  0xd7   :  { %v239_v41 = vadd.f32 %v892_v24, %v238_v33  ;;  %v259_v43 = vadd.f32 %v892_v24, %v258_v35 }
  0xd8   :  { %323 = vst [vmem:[%s1160_s3 + $0xb0] sm:$0xff] %v1059_v37 }
  0xd9   :  { %308 = vst [vmem:[%s1160_s3 + $0x38] sm:$0xff] %v239_v41  ;;  %v534_v47 = vadd.f32 %v533_v39, %v239_v41  ;;  %v572_v49 = vmul.f32 %v239_v41, %v239_v41  ;;  %v580_v20 = vmul.f32 %v259_v43, %v259_v43 }
  0xda   :  { %316 = vst [vmem:[%s1160_s3 + $0x78] sm:$0xff] %v259_v43 }
  0xdb   :  { %v535_v52 = vadd.f32 %v534_v47, %v898_v28  ;;  %v603_v53 = vadd.f32 %v602_v46, %v572_v49  ;;  %331 = vst [vmem:[%s1160_s3 + $0xf0] sm:$0xff] %v1084_v4  ;;  %v589_v47 = vmul.f32 %v927_v36, %v927_v36 }
  0xdd   :  { %v536_v56 = vadd.f32 %v535_v52, %v913_v34  ;;  %v604_v59 = vadd.f32 %v603_v53, %v573_v51  ;;  %v278_v61 = vpop.f32.mrf.mxu2  ;;  %v298_v28 = vpop.f32.mrf.mxu3  ;;  %v590_v51 = vmul.f32 %v945_v44, %v945_v44  ;;  %v591_v53 = vmul.f32 %v984_v58, %v984_v58 }
  0xde   :  { %v279_v62 = vadd.f32 %v892_v24, %v278_v61  ;;  %v1090_v34 = vadd.f32 %v892_v24, %v298_v28  ;;  %v577_v24 = vmul.f32 %v981_v57, %v981_v57 }
  0xdf   :  { %v537_v1 = vadd.f32 %v536_v56, %v938_v42  ;;  %v605_v3 = vadd.f32 %v604_v59, %v574_v54  ;;  %v592_v56 = vmul.f32 %v991_v60, %v991_v60 }
  0xe0   :  { %324 = vst [vmem:[%s1160_s3 + $0xb8] sm:$0xff] %v279_v62  ;;  %v588_v46 = vmul.f32 %v279_v62, %v279_v62 }
  0xe1   :  { %v606_v6 = vadd.f32 %v605_v3, %v575_v63  ;;  %v538_v7 = vadd.f32 %v537_v1, %v963_v50  ;;  %332 = vst [vmem:[%s1160_s3 + $0xf8] sm:$0xff] %v1090_v34  ;;  %v594_v1 = vmul.f32 %v1042_v19, %v1042_v19 }
  0xe3   :  { %v539_v42 = vadd.f32 %v538_v7, %v981_v57  ;;  %v607_v8 = vadd.f32 %v606_v6, %v576_v5  ;;  %v582_v57 = vmul.f32 %v934_v40, %v934_v40  ;;  %v595_v5 = vmul.f32 %v1084_v4, %v1084_v4 }
  0xe4   :  { %v596_v7 = vmul.f32 %v1090_v34, %v1090_v34 }
  0xe5   :  { %v540_v50 = vadd.f32 %v539_v42, %v1013_v2  ;;  %v608_v10 = vadd.f32 %v607_v8, %v577_v24  ;;  %v583_v2 = vmul.f32 %v959_v48, %v959_v48 }
  0xe7   :  { %v541_v11 = vadd.f32 %v540_v50, %v257_v16  ;;  %v609_v14 = vadd.f32 %v608_v10, %v578_v9 }
  0xe9   :  { %v610_v15 = vadd.f32 %v609_v14, %v579_v12  ;;  %v542_v18 = vadd.f32 %v541_v11, %v259_v43  ;;  %v587_v43 = vmul.f32 %v1059_v37, %v1059_v37 }
  0xeb   :  { %v543_v22 = vadd.f32 %v542_v18, %v909_v32  ;;  %v611_v23 = vadd.f32 %v610_v15, %v580_v20  ;;  %v585_v32 = vmul.f32 %v1009_v0, %v1009_v0 }
  0xed   :  { %v544_v25 = vadd.f32 %v543_v22, %v934_v40  ;;  %v612_v26 = vadd.f32 %v611_v23, %v581_v21 }
  0xef   :  { %v613_v16 = vadd.f32 %v612_v26, %v582_v57  ;;  %v545_v27 = vadd.f32 %v544_v25, %v959_v48 }
  0xf1   :  { %v546_v30 = vadd.f32 %v545_v27, %v977_v55  ;;  %v614_v31 = vadd.f32 %v613_v16, %v583_v2 }
  0xf3   :  { %v547_v33 = vadd.f32 %v546_v30, %v1009_v0  ;;  %v615_v35 = vadd.f32 %v614_v31, %v584_v29 }
  0xf5   :  { %v548_v40 = vadd.f32 %v547_v33, %v1030_v13  ;;  %v616_v39 = vadd.f32 %v615_v35, %v585_v32 }
  0xf7   :  { %v617_v41 = vadd.f32 %v616_v39, %v586_v38  ;;  %v549_v48 = vadd.f32 %v548_v40, %v1059_v37 }
  0xf9   :  { %v618_v55 = vadd.f32 %v617_v41, %v587_v43  ;;  %v550_v45 = vadd.f32 %v549_v48, %v279_v62 }
  0xfb   :  { %v551_v0 = vadd.f32 %v550_v45, %v927_v36  ;;  %v619_v49 = vadd.f32 %v618_v55, %v588_v46  ;;  %v593_v36 = vmul.f32 %v1035_v17, %v1035_v17 }
  0xfd   :  { %v552_v13 = vadd.f32 %v551_v0, %v945_v44  ;;  %v620_v52 = vadd.f32 %v619_v49, %v589_v47 }
  0xff   :  { %v621_v54 = vadd.f32 %v620_v52, %v590_v51  ;;  %v553_v37 = vadd.f32 %v552_v13, %v984_v58 }
 0x101   :  { %v554_v59 = vadd.f32 %v553_v37, %v991_v60  ;;  %v622_v61 = vadd.f32 %v621_v54, %v591_v53 }
 0x103   :  { %v555_v62 = vadd.f32 %v554_v59, %v1035_v17  ;;  %v623_v63 = vadd.f32 %v622_v61, %v592_v56 }
 0x105   :  { %v556_v44 = vadd.f32 %v555_v62, %v1042_v19  ;;  %v624_v3 = vadd.f32 %v623_v63, %v593_v36 }
 0x107   :  { %v625_v28 = vadd.f32 %v624_v3, %v594_v1  ;;  %v557_v58 = vadd.f32 %v556_v44, %v1084_v4 }
 0x109   :  { %v626_v60 = vadd.f32 %v625_v28, %v595_v5  ;;  %v558_v6 = vadd.f32 %v557_v58, %v1090_v34 }
 0x10b   :  { %v559_v17 = vrot.slane %v558_v6, 4  ;;  %v627_v24 = vadd.f32 %v626_v60, %v596_v7 }
 0x10d   :  { %v560_v42 = vadd.f32 %v559_v17, %v558_v6  ;;  %v628_v8 = vrot.slane %v627_v24, 4 }
 0x10f   :  { %v561_v9 = vrot.slane %v560_v42, 2  ;;  %v629_v50 = vadd.f32 %v628_v8, %v627_v24 }
 0x111   :  { %v562_v19 = vadd.f32 %v561_v9, %v560_v42  ;;  %v630_v10 = vrot.slane %v629_v50, 2 }
 0x113   :  { %v563_v11 = vrot.slane %v562_v19, 1  ;;  %v631_v12 = vadd.f32 %v630_v10, %v629_v50 }
 0x115   :  { %v632_v14 = vrot.slane %v631_v12, 1  ;;  %v564_v15 = vadd.f32 %v563_v11, %v562_v19 }
 0x117   :  { %v633_v4 = vadd.f32 %v632_v14, %v631_v12 }
 0x119   :  { %v635_v18 = vsel %vm634_vm0, %v564_v15, %v633_v4 }
 0x11a   :  { %v637_v20 = vsel %vm636_vm1, %v635_v18, 0.0 }
 0x11b   :  { %638 = vst [vmem:[%s1161_s4] sm:$0xff] %v637_v20 }

// kernel: _lambda_.8
= control target key start
LH: loop header
LB: loop body
LE: loop exit
PB: predicated region body
PF: predicated region fallthrough
CT: control target
= control target key end

     0   :  { %s553_s0 = inlined_call_operand.vmem [shape: f32[256,128], index: 0, kind: input, shape index: {}]   ;;  %s554_s1 = inlined_call_operand.vmem [shape: f32[1,128], index: 1, kind: input, shape index: {}]   ;;  %s555_s2 = inlined_call_operand.vmem [shape: f32[1,128], index: 2, kind: input, shape index: {}]   ;;  %s556_s3 = inlined_call_operand.vmem [shape: bf16[256,128], index: 3, kind: output, shape index: {}]  }
   0x1   :  { %v14_v0 = vld [vmem:[%s553_s0] sm:$0xff]  ;;  %v15_v1 = vld [vmem:[%s553_s0 + $0x8] sm:$0xff]  ;;  %v16_v4 = vld [vmem:[%s553_s0 + $0x10] sm:$0xff] }
   0x2   :  { %v344_v2 = vld [vmem:[%s554_s1] ss:$0 sm:$0xff]  ;;  %v17_v5 = vld [vmem:[%s553_s0 + $0x18] sm:$0xff]  ;;  %v19_v11 = vld [vmem:[%s553_s0 + $0x28] sm:$0xff] }
   0x3   :  { %v349_v3 = vld [vmem:[%s555_s2] ss:$0 sm:$0xff]  ;;  %v50_v7 = vmul.f32 %v344_v2, %v14_v0  ;;  %v51_v8 = vmul.f32 %v344_v2, %v15_v1  ;;  %v52_v9 = vmul.f32 %v344_v2, %v16_v4  ;;  %v53_v10 = vmul.f32 %v344_v2, %v17_v5  ;;  %v20_v12 = vld [vmem:[%s553_s0 + $0x30] sm:$0xff]  ;;  %v21_v13 = vld [vmem:[%s553_s0 + $0x38] sm:$0xff] }
   0x4   :  { %v18_v6 = vld [vmem:[%s553_s0 + $0x20] sm:$0xff]  ;;  %v55_v15 = vmul.f32 %v344_v2, %v19_v11  ;;  %v56_v16 = vmul.f32 %v344_v2, %v20_v12  ;;  %v57_v17 = vmul.f32 %v344_v2, %v21_v13  ;;  %v23_v27 = vld [vmem:[%s553_s0 + $0x48] sm:$0xff]  ;;  %v24_v32 = vld [vmem:[%s553_s0 + $0x50] sm:$0xff] }
   0x5   :  { %v54_v14 = vmul.f32 %v344_v2, %v18_v6  ;;  %v86_v18 = vadd.f32 %v349_v3, %v50_v7  ;;  %v87_v19 = vadd.f32 %v349_v3, %v51_v8  ;;  %v88_v20 = vadd.f32 %v349_v3, %v52_v9  ;;  %v22_v26 = vld [vmem:[%s553_s0 + $0x40] sm:$0xff]  ;;  %v25_v33 = vld [vmem:[%s553_s0 + $0x58] sm:$0xff]  ;;  %v27_v39 = vld [vmem:[%s553_s0 + $0x68] sm:$0xff] }
   0x6   :  { %v89_v21 = vadd.f32 %v349_v3, %v53_v10  ;;  %v91_v23 = vadd.f32 %v349_v3, %v55_v15  ;;  %v92_v24 = vadd.f32 %v349_v3, %v56_v16  ;;  %v93_v25 = vadd.f32 %v349_v3, %v57_v17  ;;  %v26_v38 = vld [vmem:[%s553_s0 + $0x60] sm:$0xff]  ;;  %v28_v44 = vld [vmem:[%s553_s0 + $0x70] sm:$0xff]  ;;  %v29_v45 = vld [vmem:[%s553_s0 + $0x78] sm:$0xff] }
   0x7   :  { %v90_v22 = vadd.f32 %v349_v3, %v54_v14  ;;  %v118_v28 = vmax.f32 %v86_v18, 0.0  ;;  %v119_v29 = vmax.f32 %v87_v19, 0.0  ;;  %v120_v30 = vmax.f32 %v88_v20, 0.0  ;;  %v30_v58 = vld [vmem:[%s553_s0 + $0x80] sm:$0xff]  ;;  %v31_v63 = vld [vmem:[%s553_s0 + $0x88] sm:$0xff]  ;;  %v32_v6 = vld [vmem:[%s553_s0 + $0x90] sm:$0xff] }
   0x8   :  { %v121_v31 = vmax.f32 %v89_v21, 0.0  ;;  %v123_v35 = vmax.f32 %v91_v23, 0.0  ;;  %v124_v36 = vmax.f32 %v92_v24, 0.0  ;;  %v125_v37 = vmax.f32 %v93_v25, 0.0  ;;  %v33_v7 = vld [vmem:[%s553_s0 + $0x98] sm:$0xff]  ;;  %v34_v12 = vld [vmem:[%s553_s0 + $0xa0] sm:$0xff] }
   0x9   :  { %v122_v34 = vmax.f32 %v90_v22, 0.0  ;;  %v221_v40 = vpack.c.bf16 %v119_v29, %v118_v28  ;;  %v58_v42 = vmul.f32 %v344_v2, %v22_v26  ;;  %v59_v43 = vmul.f32 %v344_v2, %v23_v27  ;;  %v35_v13 = vld [vmem:[%s553_s0 + $0xa8] sm:$0xff]  ;;  %v36_v18 = vld [vmem:[%s553_s0 + $0xb0] sm:$0xff]  ;;  %v37_v23 = vld [vmem:[%s553_s0 + $0xb8] sm:$0xff] }
   0xa   :  { %v226_v41 = vpack.c.bf16 %v121_v31, %v120_v30  ;;  %v236_v47 = vpack.c.bf16 %v125_v37, %v124_v36  ;;  %v60_v48 = vmul.f32 %v344_v2, %v24_v32  ;;  %v61_v49 = vmul.f32 %v344_v2, %v25_v33  ;;  %v38_v28 = vld [vmem:[%s553_s0 + $0xc0] sm:$0xff]  ;;  %v39_v37 = vld [vmem:[%s553_s0 + $0xc8] sm:$0xff] }
   0xb   :  { %v231_v46 = vpack.c.bf16 %v123_v35, %v122_v34  ;;  %222 = vst [vmem:[%s556_s3] sm:$0xff] %v221_v40   ;;  %v94_v50 = vadd.f32 %v349_v3, %v58_v42  ;;  %v95_v51 = vadd.f32 %v349_v3, %v59_v43  ;;  %v62_v52 = vmul.f32 %v344_v2, %v26_v38  ;;  %v40_v42 = vld [vmem:[%s553_s0 + $0xd0] sm:$0xff]  ;;  %v41_v43 = vld [vmem:[%s553_s0 + $0xd8] sm:$0xff] }
   0xc   :  { %v63_v53 = vmul.f32 %v344_v2, %v27_v39  ;;  %298 = vst [vmem:[%s556_s3 + $0x8] sm:$0xff] %v226_v41   ;;  %v96_v54 = vadd.f32 %v349_v3, %v60_v48  ;;  %v97_v55 = vadd.f32 %v349_v3, %v61_v49  ;;  %v64_v56 = vmul.f32 %v344_v2, %v28_v44  ;;  %v42_v48 = vld [vmem:[%s553_s0 + $0xe0] sm:$0xff]  ;;  %v43_v49 = vld [vmem:[%s553_s0 + $0xe8] sm:$0xff] }
   0xd   :  { %v65_v57 = vmul.f32 %v344_v2, %v29_v45  ;;  %299 = vst [vmem:[%s556_s3 + $0x10] sm:$0xff] %v231_v46   ;;  %v126_v59 = vmax.f32 %v94_v50, 0.0  ;;  %v127_v60 = vmax.f32 %v95_v51, 0.0  ;;  %v98_v61 = vadd.f32 %v349_v3, %v62_v52 }
   0xe   :  { %v99_v62 = vadd.f32 %v349_v3, %v63_v53  ;;  %300 = vst [vmem:[%s556_s3 + $0x18] sm:$0xff] %v236_v47   ;;  %v128_v0 = vmax.f32 %v96_v54, 0.0  ;;  %v129_v1 = vmax.f32 %v97_v55, 0.0  ;;  %v100_v4 = vadd.f32 %v349_v3, %v64_v56  ;;  %v44_v54 = vld [vmem:[%s553_s0 + $0xf0] sm:$0xff] }
   0xf   :  { %v101_v5 = vadd.f32 %v349_v3, %v65_v57  ;;  %v241_v8 = vpack.c.bf16 %v127_v60, %v126_v59  ;;  %v130_v9 = vmax.f32 %v98_v61, 0.0  ;;  %v66_v11 = vmul.f32 %v344_v2, %v30_v58  ;;  %v45_v59 = vld [vmem:[%s553_s0 + $0xf8] sm:$0xff] }
  0x10   :  { %v131_v10 = vmax.f32 %v99_v62, 0.0  ;;  %v246_v14 = vpack.c.bf16 %v129_v1, %v128_v0  ;;  %v132_v15 = vmax.f32 %v100_v4, 0.0  ;;  %v67_v17 = vmul.f32 %v344_v2, %v31_v63 }
  0x11   :  { %v133_v16 = vmax.f32 %v101_v5, 0.0  ;;  %301 = vst [vmem:[%s556_s3 + $0x20] sm:$0xff] %v241_v8   ;;  %v102_v20 = vadd.f32 %v349_v3, %v66_v11  ;;  %v68_v21 = vmul.f32 %v344_v2, %v32_v6  ;;  %v69_v22 = vmul.f32 %v344_v2, %v33_v7 }
  0x12   :  { %v251_v19 = vpack.c.bf16 %v131_v10, %v130_v9  ;;  %302 = vst [vmem:[%s556_s3 + $0x28] sm:$0xff] %v246_v14   ;;  %v103_v25 = vadd.f32 %v349_v3, %v67_v17  ;;  %v70_v26 = vmul.f32 %v344_v2, %v34_v12  ;;  %v71_v27 = vmul.f32 %v344_v2, %v35_v13 }
  0x13   :  { %v256_v24 = vpack.c.bf16 %v133_v16, %v132_v15  ;;  %v134_v29 = vmax.f32 %v102_v20, 0.0  ;;  %v104_v30 = vadd.f32 %v349_v3, %v68_v21  ;;  %v105_v31 = vadd.f32 %v349_v3, %v69_v22 }
  0x14   :  { %303 = vst [vmem:[%s556_s3 + $0x30] sm:$0xff] %v251_v19   ;;  %v72_v32 = vmul.f32 %v344_v2, %v36_v18  ;;  %v135_v33 = vmax.f32 %v103_v25, 0.0  ;;  %v106_v34 = vadd.f32 %v349_v3, %v70_v26  ;;  %v107_v35 = vadd.f32 %v349_v3, %v71_v27 }
  0x15   :  { %304 = vst [vmem:[%s556_s3 + $0x38] sm:$0xff] %v256_v24   ;;  %v73_v36 = vmul.f32 %v344_v2, %v37_v23  ;;  %v136_v38 = vmax.f32 %v104_v30, 0.0  ;;  %v137_v39 = vmax.f32 %v105_v31, 0.0  ;;  %v74_v41 = vmul.f32 %v344_v2, %v38_v28 }
  0x16   :  { %v108_v40 = vadd.f32 %v349_v3, %v72_v32  ;;  %v261_v44 = vpack.c.bf16 %v135_v33, %v134_v29  ;;  %v138_v45 = vmax.f32 %v106_v34, 0.0  ;;  %v139_v46 = vmax.f32 %v107_v35, 0.0 }
  0x17   :  { %v109_v47 = vadd.f32 %v349_v3, %v73_v36  ;;  %v266_v50 = vpack.c.bf16 %v137_v39, %v136_v38  ;;  %v75_v52 = vmul.f32 %v344_v2, %v39_v37  ;;  %v110_v53 = vadd.f32 %v349_v3, %v74_v41 }
  0x18   :  { %v140_v51 = vmax.f32 %v108_v40, 0.0  ;;  %305 = vst [vmem:[%s556_s3 + $0x40] sm:$0xff] %v261_v44   ;;  %v271_v55 = vpack.c.bf16 %v139_v46, %v138_v45  ;;  %v76_v57 = vmul.f32 %v344_v2, %v40_v42  ;;  %v77_v58 = vmul.f32 %v344_v2, %v41_v43 }
  0x19   :  { %v141_v56 = vmax.f32 %v109_v47, 0.0  ;;  %306 = vst [vmem:[%s556_s3 + $0x48] sm:$0xff] %v266_v50   ;;  %v111_v60 = vadd.f32 %v349_v3, %v75_v52  ;;  %v142_v61 = vmax.f32 %v110_v53, 0.0  ;;  %v78_v62 = vmul.f32 %v344_v2, %v42_v48 }
  0x1a   :  { %v79_v63 = vmul.f32 %v344_v2, %v43_v49  ;;  %307 = vst [vmem:[%s556_s3 + $0x50] sm:$0xff] %v271_v55   ;;  %v112_v1 = vadd.f32 %v349_v3, %v76_v57  ;;  %v113_v4 = vadd.f32 %v349_v3, %v77_v58  ;;  %v80_v5 = vmul.f32 %v344_v2, %v44_v54 }
  0x1b   :  { %v276_v0 = vpack.c.bf16 %v141_v56, %v140_v51  ;;  %v143_v6 = vmax.f32 %v111_v60, 0.0  ;;  %v114_v7 = vadd.f32 %v349_v3, %v78_v62  ;;  %v81_v9 = vmul.f32 %v344_v2, %v45_v59 }
  0x1c   :  { %v115_v8 = vadd.f32 %v349_v3, %v79_v63  ;;  %v144_v10 = vmax.f32 %v112_v1, 0.0  ;;  %v145_v11 = vmax.f32 %v113_v4, 0.0  ;;  %v116_v12 = vadd.f32 %v349_v3, %v80_v5 }
  0x1d   :  { %308 = vst [vmem:[%s556_s3 + $0x58] sm:$0xff] %v276_v0   ;;  %v281_v13 = vpack.c.bf16 %v143_v6, %v142_v61  ;;  %v146_v14 = vmax.f32 %v114_v7, 0.0  ;;  %v117_v16 = vadd.f32 %v349_v3, %v81_v9 }
  0x1e   :  { %v147_v15 = vmax.f32 %v115_v8, 0.0  ;;  %v286_v17 = vpack.c.bf16 %v145_v11, %v144_v10  ;;  %v148_v18 = vmax.f32 %v116_v12, 0.0 }
  0x1f   :  { %309 = vst [vmem:[%s556_s3 + $0x60] sm:$0xff] %v281_v13   ;;  %v149_v19 = vmax.f32 %v117_v16, 0.0 }
  0x20   :  { %v291_v2 = vpack.c.bf16 %v147_v15, %v146_v14  ;;  %310 = vst [vmem:[%s556_s3 + $0x68] sm:$0xff] %v286_v17  }
  0x21   :  { %v296_v20 = vpack.c.bf16 %v149_v19, %v148_v18 }
  0x22   :  { %311 = vst [vmem:[%s556_s3 + $0x70] sm:$0xff] %v291_v2  }
  0x23   :  { %312 = vst [vmem:[%s556_s3 + $0x78] sm:$0xff] %v296_v20  }

// kernel: _lambda_.9
= control target key start
LH: loop header
LB: loop body
LE: loop exit
PB: predicated region body
PF: predicated region fallthrough
CT: control target
= control target key end

     0   :  { %s1095_s18 = smov 0   ;;  %s1097_s19 = smov 0   ;;  %s1255_s0 = inlined_call_operand.vmem [shape: bf16[3,8,1024], index: 0, kind: input, shape index: {}]   ;;  %s1256_s1 = inlined_call_operand.vmem [shape: bf16[3,1024,64], index: 1, kind: input, shape index: {}]   ;;  %s1257_s2 = inlined_call_operand.vmem [shape: f32[3,1,64], index: 2, kind: input, shape index: {}]   ;;  %s1258_s3 = inlined_call_operand.vmem [shape: f32[64,128], index: 3, kind: input, shape index: {}]   ;;  %s1259_s4 = inlined_call_operand.vmem [shape: f32[1,128], index: 4, kind: input, shape index: {}]   ;;  %s1260_s5 = inlined_call_operand.vmem [shape: f32[8,128], index: 5, kind: output, shape index: {}]  }
   0x1   :  { %s1099_s20 = smov 0   ;;  %s1101_s21 = smov 0  }
   0x2   :  { %s1103_s22 = smov 0  }
   0x3 LB: > { %s24_s23 = sadd.s32 1, %s1053_s20  ;;  %s27_s24 = sadd.s32 1, %s1057_s21  ;;  %s1061_s22 = sphi %s1103_s22, %s15_s22   ;;  %s1057_s21 = sphi %s1101_s21, %s1265_s21   ;;  %s1053_s20 = sphi %s1099_s20, %s1264_s20   ;;  %s1049_s19 = sphi %s1097_s19, %s1263_s19   ;;  %s1045_s18 = sphi %s1095_s18, %s1262_s18  }
   0x4   : > { %p25_p0 = scmp.ge.s32.totalorder %s24_s23, 2  ;;  %p802_p1 = scmp.ge.s32.totalorder %s1061_s22, 1 }
   0x5   : > { %p226_p2 = scmp.lt.s32.totalorder %s1061_s22, 7 }
   0x6   : > { %s1267_s23 = smov (%p25_p0, %s24_s23), 0  ;;  %s1269_s24 = smov (!%p25_p0, %s27_s24), %s1057_s21 }
   0x7   : > { %p227_p3 = pnand %p802_p1, %p226_p2  ;;  %p29_p4 = scmp.ge.s32.totalorder %s1269_s24, 3 }
   0x8   : > { %s803_s25 = sshll.u32 (!%p227_p3), %s1045_s18, 2  ;;  %p266_p5 = scmp.lt.s32.totalorder (!%p227_p3), %s1049_s19, 2 }
   0x9   : > { %s1271_s24 = smov (%p29_p4, %s1269_s24), 0  ;;  %230 = sbr.rel (%p227_p3) target bundleno = 765 (0x2fd), region = 40 }
   0xa   : > { %p268_p6 = scmp.lt.s32.totalorder (!%p227_p3), %s803_s25, 7  ;;  %s806_s26 = sshll.u32 (!%p227_p3), %s1045_s18, 6 }
   0xb   : > { %p278_p7 = scmp.lt.s32.totalorder (!%p227_p3), %s806_s26, 127  ;;  %p288_p8 = scmp.eq.s32.totalorder (!%p227_p3), %s1045_s18, 1 }
   0xc   : > { %p809_p9 = scmp.ne.s32.totalorder (!%p227_p3), %s1045_s18, 0 }
   0xe   : > { %s267_s27 = scalar_select %p266_p5, %s1049_s19, 2 }
   0xf   : > { %s1273_s25 = smov (!%p268_p6, %s803_s25), 7  ;;  %s1275_s26 = smov (!%p278_p7, %s806_s26), 127 }
  0x10   : > { %s804_s28 = sshll.u32 %s267_s27, 3  ;;  %s807_s30 = sshll.u32 %s267_s27, 7 }
  0x11   : > { %s271_s29 = sadd.s32 %s804_s28, %s1273_s25  ;;  %s1136_s9 = scalar_lea.vmem %s1257_s2, %s267_s27 }
  0x12   : > { %s805_s6 = sshll.u32 %s271_s29, 2  ;;  %s281_s13 = sadd.s32 %s807_s30, %s1275_s26 }
  0x13   : > { %s1141_s12 = scalar_lea.vmem %s1255_s0, %s805_s6  ;;  %s808_s14 = sshll.u32 %s281_s13, 2 }
  0x14   : > { %s1147_s17 = scalar_lea.vmem %s1256_s1, %s808_s14  ;;  %292 = sbr.rel (%p809_p9) target bundleno = 27 (0x1b), region = 44 }
  0x19   : > { %vm293_vm0 = vcmask 523264   ;;  %v1063_v0 = vmov 0.0  }
  0x1a   : > { %294 = vst.msk [vmem:[#allocation2] sm:$0xff] %vm293_vm0, %v1063_v0 }
  0x1b PF: > { %v949_v1 = vld [vmem:[%s1147_s17 + $0x38] sm:$0xff]  ;;  %v948_v5 = vld [vmem:[%s1147_s17 + $0x30] sm:$0xff]  ;;  %v947_v9 = vld [vmem:[%s1147_s17 + $0x28] sm:$0xff]  ;;  %p623_p10 = scmp.eq.s32.totalorder %s1049_s19, 0  ;;  %vm621_vm1 = vcmask 523264  }
  0x1c   : > { %v957_v2 = vld [vmem:[%s1147_s17 + $0x78] sm:$0xff]  ;;  %568 = vmatpush.bf16.msra.mxu0 %v949_v1  ;;  %v956_v6 = vld [vmem:[%s1147_s17 + $0x70] sm:$0xff]  ;;  %v955_v10 = vld [vmem:[%s1147_s17 + $0x68] sm:$0xff] }
  0x1d   : > { %v965_v3 = vld [vmem:[%s1147_s17 + $0xb8] sm:$0xff]  ;;  %581 = vmatpush.bf16.msra.mxu1 %v957_v2  ;;  %v964_v7 = vld [vmem:[%s1147_s17 + $0xb0] sm:$0xff]  ;;  %v963_v11 = vld [vmem:[%s1147_s17 + $0xa8] sm:$0xff]  ;;  %p1187_p11 = pnand %p623_p10, %p288_p8 }
  0x1e   : > { %v973_v4 = vld [vmem:[%s1147_s17 + $0xf8] sm:$0xff]  ;;  %594 = vmatpush.bf16.msra.mxu2 %v965_v3  ;;  %v972_v8 = vld [vmem:[%s1147_s17 + $0xf0] sm:$0xff]  ;;  %v971_v12 = vld [vmem:[%s1147_s17 + $0xe8] sm:$0xff] }
  0x1f   : > { %607 = vmatpush.bf16.msra.mxu3 %v973_v4  ;;  %v946_v13 = vld [vmem:[%s1147_s17 + $0x20] sm:$0xff]  ;;  %v945_v17 = vld [vmem:[%s1147_s17 + $0x18] sm:$0xff]  ;;  %v944_v21 = vld [vmem:[%s1147_s17 + $0x10] sm:$0xff] }
  0x20   : > { %569 = vmatpush.bf16.msra.mxu0 %v948_v5  ;;  %v954_v14 = vld [vmem:[%s1147_s17 + $0x60] sm:$0xff]  ;;  %v953_v18 = vld [vmem:[%s1147_s17 + $0x58] sm:$0xff]  ;;  %v952_v22 = vld [vmem:[%s1147_s17 + $0x50] sm:$0xff] }
  0x21   : > { %582 = vmatpush.bf16.msra.mxu1 %v956_v6  ;;  %v962_v15 = vld [vmem:[%s1147_s17 + $0xa0] sm:$0xff]  ;;  %v961_v19 = vld [vmem:[%s1147_s17 + $0x98] sm:$0xff]  ;;  %v960_v23 = vld [vmem:[%s1147_s17 + $0x90] sm:$0xff] }
  0x22   : > { %595 = vmatpush.bf16.msra.mxu2 %v964_v7  ;;  %v970_v16 = vld [vmem:[%s1147_s17 + $0xe0] sm:$0xff]  ;;  %v969_v20 = vld [vmem:[%s1147_s17 + $0xd8] sm:$0xff]  ;;  %v968_v24 = vld [vmem:[%s1147_s17 + $0xd0] sm:$0xff] }
  0x23   : > { %608 = vmatpush.bf16.msra.mxu3 %v972_v8  ;;  %v943_v25 = vld [vmem:[%s1147_s17 + $0x8] sm:$0xff]  ;;  %v296_v27 = vld [vmem:[%s1141_s12] sm:$0xff] }
  0x24   : > { %570 = vmatpush.bf16.msra.mxu0 %v947_v9  ;;  %v951_v26 = vld [vmem:[%s1147_s17 + $0x48] sm:$0xff]  ;;  %v364_v31 = vunpack.c.l.b16 %v296_v27  ;;  %v365_v32 = vunpack.c.h.b16 %v296_v27  ;;  %v942_v33 = vld [vmem:[%s1147_s17] sm:$0xff] }
  0x25   : > { %583 = vmatpush.bf16.msra.mxu1 %v955_v10  ;;  %v959_v28 = vld [vmem:[%s1147_s17 + $0x88] sm:$0xff]  ;;  %v950_v34 = vld [vmem:[%s1147_s17 + $0x40] sm:$0xff] }
  0x26   : > { %596 = vmatpush.bf16.msra.mxu2 %v963_v11  ;;  %v967_v29 = vld [vmem:[%s1147_s17 + $0xc8] sm:$0xff]  ;;  %v958_v37 = vld [vmem:[%s1147_s17 + $0x80] sm:$0xff]  ;;  %v368_v39 = vpack.c.b16 %v364_v31, %v364_v31  ;;  %v369_v40 = vpack.c.b16 %v365_v32, %v365_v32 }
  0x27   : > { %609 = vmatpush.bf16.msra.mxu3 %v971_v12  ;;  %v297_v30 = vld [vmem:[%s1141_s12 + $0x8] sm:$0xff]  ;;  %v966_v38 = vld [vmem:[%s1147_s17 + $0xc0] sm:$0xff] }
  0x28   : > { %571 = vmatpush.bf16.msra.mxu0 %v946_v13  ;;  %v366_v35 = vunpack.c.l.b16 %v297_v30  ;;  %v367_v36 = vunpack.c.h.b16 %v297_v30  ;;  %v295_v51 = vld [vmem:[#allocation2] sm:$0xff] }
  0x29   : > { %584 = vmatpush.bf16.msra.mxu1 %v954_v14 }
  0x2a   : > { %597 = vmatpush.bf16.msra.mxu2 %v962_v15  ;;  %v370_v41 = vpack.c.b16 %v366_v35, %v366_v35  ;;  %v371_v42 = vpack.c.b16 %v367_v36, %v367_v36 }
  0x2b   : > { %610 = vmatpush.bf16.msra.mxu3 %v970_v16 }
  0x2c   : > { %572 = vmatpush.bf16.msra.mxu0 %v945_v17 }
  0x2d   : > { %585 = vmatpush.bf16.msra.mxu1 %v953_v18 }
  0x2e   : > { %598 = vmatpush.bf16.msra.mxu2 %v961_v19 }
  0x2f   : > { %611 = vmatpush.bf16.msra.mxu3 %v969_v20 }
  0x30   : > { %573 = vmatpush.bf16.msra.mxu0 %v944_v21 }
  0x31   : > { %586 = vmatpush.bf16.msra.mxu1 %v952_v22 }
  0x32   : > { %599 = vmatpush.bf16.msra.mxu2 %v960_v23 }
  0x33   : > { %612 = vmatpush.bf16.msra.mxu3 %v968_v24 }
  0x34   : > { %574 = vmatpush.bf16.msra.mxu0 %v943_v25 }
  0x35   : > { %587 = vmatpush.bf16.msra.mxu1 %v951_v26 }
  0x36   : > { %600 = vmatpush.bf16.msra.mxu2 %v959_v28 }
  0x37   : > { %613 = vmatpush.bf16.msra.mxu3 %v967_v29 }
  0x38   : > { %575 = vmatpush.bf16.msra.mxu0 %v942_v33 }
  0x39   : > { %588 = vmatpush.bf16.msra.mxu1 %v950_v34 }
  0x3a   : > { %601 = vmatpush.bf16.msra.mxu2 %v958_v37 }
  0x3b   : > { %614 = vmatpush.bf16.msra.mxu3 %v966_v38  ;;  %576 = vmatmul.bf16.vlgmr.msra.gmra.mxu0 %v368_v39 }
  0x3c   : > { %589 = vmatmul.bf16.vlgmr.msra.gmra.mxu1 %v369_v40 }
  0x3d   : > { %602 = vmatmul.bf16.vlgmr.msra.gmra.mxu2 %v370_v41 }
  0x3e   : > { %615 = vmatmul.bf16.vlgmr.msra.gmra.mxu3 %v371_v42 }
  0xb8   : > { %v577_v43 = vpop.f32.mrf.mxu0 }
  0xb9   : > { %v590_v44 = vpop.f32.mrf.mxu1 }
  0xba   : > { %v591_v45 = vadd.f32 %v590_v44, %v577_v43 }
  0xc0   : > { %v603_v46 = vpop.f32.mrf.mxu2  ;;  %v579_v49 = vpop.f32.mrf.mxu0 }
  0xc1   : > { %v616_v47 = vpop.f32.mrf.mxu3  ;;  %v604_v48 = vadd.f32 %v603_v46, %v591_v45  ;;  %v592_v50 = vpop.f32.mrf.mxu1 }
  0xc3   : > { %v617_v52 = vadd.f32 %v616_v47, %v604_v48 }
  0xc5   : > { %v620_v53 = vadd.f32 %v617_v52, %v295_v51  ;;  %627 = sbr.rel (%p1187_p11) target bundleno = 474 (0x1da), region = 48 }
  0xc7   : > { %622 = vst.msk [vmem:[#allocation2] sm:$0xff] %vm621_vm1, %v620_v53 }
  0xc8   : > { %v605_v54 = vpop.f32.mrf.mxu2 }
  0xc9   : > { %v618_v55 = vpop.f32.mrf.mxu3 }
  0xca   : > { %v1016_v57 = vld [vmem:[%s1136_s9] ss:$0 sm:$0xff]  ;;  %v1064_v1 = vmov 0.0  }
  0xcb   : > { %659 = vst.msk [vmem:[#allocation4] sm:$0xff] %vm621_vm1, %v1064_v1 }
  0xce   : > { %v628_v56 = vld [vmem:[#allocation2] sm:$0xff] }
  0xcf   : > { %v633_v58 = vadd.f32 %v1016_v57, %v628_v56 }
  0xd1   : > { %v634_v59 = vsel %vm621_vm1, %v633_v58, -inf }
  0xd2   : > { %635 = vmax.xlane.f32.xlu0 %v634_v59 }
 0x145   : > { %v636_v60 = vpop.xlane.xlu0 %635 }
 0x146   : > { %v637_v61 = vsub.f32 %v633_v58, %v636_v60 }
 0x148   : > { %v638_v62 = vmul.f32 1.442695, %v637_v61 }
 0x14a   : > { %1017 = vpow2.f32 %v638_v62 }
 0x150   : > { %v1018_v63 = vpop.eup %1017 }
 0x151   : > { %v640_v0 = vsel %vm621_vm1, %v1018_v63, 0.0 }
 0x152   : > { %641 = vadd.xlane.f32.xlu0 %v640_v0 }
 0x1c5   : > { %v642_v2 = vpop.xlane.xlu0 %641 }
 0x1c6   : > { %1019 = vrcp.f32 %v642_v2  ;;  %v654_v6 = vand.u32 2147483648, %v642_v2  ;;  %v652_v8 = vand.u32 2147483647, %v642_v2  ;;  %vm648_vm3 = vweird.f32 %v642_v2 }
 0x1c8   : > { %v655_v10 = vor.u32 1.1754944e-38, %v654_v6  ;;  %vm653_vm5 = vcmp.eq.f32.partialorder %v652_v8, 8.507059e+37 }
 0x1cc   : > { %v1020_v3 = vpop.eup %1019 }
 0x1cd   : > { %v644_v4 = vmul.f32 %v1020_v3, %v642_v2  ;;  %vm649_vm2 = vweird.f32 %v1020_v3 }
 0x1ce   : > { %vm650_vm4 = vmor %vm648_vm3, %vm649_vm2 }
 0x1cf   : > { %v645_v5 = vsub.f32 1.0, %v644_v4 }
 0x1d1   : > { %v646_v7 = vmul.f32 %v1020_v3, %v645_v5 }
 0x1d3   : > { %v647_v9 = vadd.f32 %v1020_v3, %v646_v7 }
 0x1d5   : > { %v651_v11 = vsel %vm650_vm4, %v1020_v3, %v647_v9 }
 0x1d6   : > { %v656_v12 = vsel %vm653_vm5, %v655_v10, %v651_v11 }
 0x1d7   : > { %v657_v13 = vmul.f32 %v1018_v63, %v656_v12 }
 0x1d9   : > { %658 = vst.msk [vmem:[#allocation3] sm:$0xff] %vm621_vm1, %v657_v13 }
 0x1da PF: > { %p660_p12 = scmp.gt.s32.totalorder %s1049_s19, 0 }
 0x1dc   : > { %p661_p13 = pnand %p660_p12, %p288_p8 }
 0x1dd   : > { %s938_s26 = sadd.s32 (!%p661_p13), 4294967295, %s1049_s19 }
 0x1de   : > { %664 = sbr.rel (%p661_p13) target bundleno = 611 (0x263), region = 52 }
 0x1e3   : > { %v671_v14 = vlaneseq  ;;  %v674_v15 = vstv %s938_s26  ;;  %v676_v17 = vld [vmem:[#allocation3] sm:$0xff]  ;;  %v1021_v20 = vld [vmem:[%s1136_s9] ss:$0 sm:$0xff]  ;;  %v681_v24 = vld [vmem:[#allocation4] sm:$0xff] }
 0x1e4   : > { %v665_v21 = vld [vmem:[#allocation2] sm:$0xff] }
 0x1e5   : > { %v672_v16 = vand.u32 127, %v671_v14  ;;  %v670_v22 = vadd.f32 %v1021_v20, %v665_v21 }
 0x1e7   : > { %vm675_vm6 = vcmp.eq.s32.totalorder %v672_v16, %v674_v15 }
 0x1e8   : > { %v677_v18 = vsel %vm675_vm6, %v676_v17, 0.0 }
 0x1e9   : > { %v678_v19 = vsel %vm621_vm1, %v677_v18, 0.0 }
 0x1ea   : > { %679 = vadd.xlane.f32.xlu0 %v678_v19 }
 0x25d   : > { %v680_v23 = vpop.xlane.xlu0 %679 }
 0x25e   : > { %v682_v25 = vmul.f32 %v680_v23, %v670_v22 }
 0x260   : > { %v683_v26 = vadd.f32 %v682_v25, %v681_v24 }
 0x262   : > { %684 = vst.msk [vmem:[#allocation4] sm:$0xff] %vm621_vm1, %v683_v26 }
 0x263 PF: > { %p685_p0 = scmp.eq.s32.totalorder %s1049_s19, 2 }
 0x265   : > { %p686_p1 = pnand %p685_p0, %p288_p8 }
 0x267   : > { %689 = sbr.rel (%p686_p1) target bundleno = 765 (0x2fd), region = 56 }
 0x26c   : > { %v698_v27 = vld [vmem:[%s1258_s3 + $0x38] sm:$0xff]  ;;  %v697_v28 = vld [vmem:[%s1258_s3 + $0x30] sm:$0xff]  ;;  %v696_v29 = vld [vmem:[%s1258_s3 + $0x28] sm:$0xff] }
 0x26d   : > { %714 = vmatpush.msra.mxu0 %v698_v27  ;;  %v695_v30 = vld [vmem:[%s1258_s3 + $0x20] sm:$0xff]  ;;  %v694_v31 = vld [vmem:[%s1258_s3 + $0x18] sm:$0xff]  ;;  %v693_v32 = vld [vmem:[%s1258_s3 + $0x10] sm:$0xff] }
 0x26e   : > { %v692_v33 = vld [vmem:[%s1258_s3 + $0x8] sm:$0xff]  ;;  %v691_v34 = vld [vmem:[%s1258_s3] sm:$0xff]  ;;  %v690_v35 = vld [vmem:[#allocation4] sm:$0xff] }
 0x26f   : > { %715 = vmatpush.msra.mxu0 %v697_v28  ;;  %v1022_v36 = vld [vmem:[%s1259_s4] ss:$0 sm:$0xff] }
 0x271   : > { %716 = vmatpush.msra.mxu0 %v696_v29 }
 0x273   : > { %717 = vmatpush.msra.mxu0 %v695_v30 }
 0x275   : > { %718 = vmatpush.msra.mxu0 %v694_v31 }
 0x277   : > { %719 = vmatpush.msra.mxu0 %v693_v32 }
 0x279   : > { %720 = vmatpush.msra.mxu0 %v692_v33 }
 0x27b   : > { %721 = vmatpush.msra.mxu0 %v691_v34 }
 0x27c   : > { %939 = vmatmul.msk.f32.vlgmr.msra.gmra.mxu0 %vm621_vm1, %v690_v35 }
 0x2f9   : > { %v723_v37 = vpop.f32.mrf.mxu0 }
 0x2fa   : > { %v724_v38 = vadd.f32 %v1022_v36, %v723_v37 }
 0x2fc   : > { %726 = vst [vmem:[%s1260_s5] sm:$0xff] %v724_v38 }
 0x2fd PF: > { %s15_s22 = sadd.s32 1, %s1061_s22   ;;  %s1262_s18 = smov %s1053_s20 }
 0x2fe   : > { %p12_p2 = scmp.ge.s32.totalorder %s15_s22, 8   ;;  %s1263_s19 = smov %s1057_s21 }
 0x2ff   : > { %s1264_s20 = smov %s1267_s23  ;;  %s1265_s21 = smov %s1271_s24 }
 0x300   :  { %14 = sbr.rel (!%p12_p2) target bundleno = 3 (0x3), region = 88 }

</bundles_post_ra>
